<compile_context>
chip_gen: v6e
topology: v6e:2x2x1
jax: 0.10.0
libtpu: 0.0.40
codegen_flags: <defaults>
</compile_context>

<pallas_src>
import functools

import jax
import jax.numpy as jnp
from jax.experimental import pallas as pl
from jax.experimental.pallas import tpu as pltpu


def _round_up(x, m):
    return (x + m - 1) // m * m


# --------------------------------------------------------------------------------------
# Kernel
# --------------------------------------------------------------------------------------
def _dp_kernel(x_ref, w1_ref, w2_ref, pp_ref, m_ref, o_ref,
               *, t_tile, t_hid, pad, ksize, t_valid, eps):
    g = pl.program_id(1)
    t0 = g * t_tile                      # first real output row handled by this tile

    # x block is already the halo'd window for this tile (t_x rows), DMA'd per step.
    xv = x_ref[0, 0]                     # (t_x, c_in), in x.dtype

    # ---- conv1 as K-tap MXU accumulation + bias + ReLU --------------------------------
    h = jnp.dot(xv[0:t_hid, :], w1_ref[0], preferred_element_type=jnp.float32)
    for k in range(1, ksize):
        h = h + jnp.dot(xv[k:k + t_hid, :], w1_ref[k],
                        preferred_element_type=jnp.float32)
    h = jnp.maximum(h + pp_ref[0:1, :], 0.0)            # (t_hid, F) f32

    # ---- LayerNorm 1 (one-pass stats: both reductions issue concurrently) -------------
    m1 = jnp.mean(h, axis=-1, keepdims=True)
    q1 = jnp.mean(h * h, axis=-1, keepdims=True)
    h = (h - m1) * jax.lax.rsqrt(q1 - m1 * m1 + eps) * pp_ref[1:2, :] + pp_ref[2:3, :]
    # TODO(synk): nn.Dropout is the identity here (eval-mode forward).

    # Zero hidden rows outside the real sequence [0, T): reproduces conv2's zero padding
    # at sequence boundaries and keeps the tile-alignment tail at zero.
    row = jax.lax.broadcasted_iota(jnp.int32, (t_hid, 1), 0) + (t0 - pad)
    h = jnp.where((row >= 0) & (row < t_valid), h, 0.0)
    h = h.astype(x_ref.dtype)            # keep MXU operands in the (possibly bf16) in-dtype

    # ---- conv2 as K-tap MXU accumulation + bias + ReLU --------------------------------
    h2 = jnp.dot(h[0:t_tile, :], w2_ref[0], preferred_element_type=jnp.float32)
    for k in range(1, ksize):
        h2 = h2 + jnp.dot(h[k:k + t_tile, :], w2_ref[k],
                          preferred_element_type=jnp.float32)
    h2 = jnp.maximum(h2 + pp_ref[3:4, :], 0.0)           # (t_tile, F) f32

    # ---- LayerNorm 2 -------------------------------------------------------------------
    m2 = jnp.mean(h2, axis=-1, keepdims=True)
    q2 = jnp.mean(h2 * h2, axis=-1, keepdims=True)
    h2 = (h2 - m2) * jax.lax.rsqrt(q2 - m2 * m2 + eps) * pp_ref[4:5, :] + pp_ref[5:6, :]
    # TODO(synk): second nn.Dropout is the identity here (eval-mode forward).

    # ---- Linear(F -> 1) + squeeze + mask: lane-dense (1, t_tile) output ---------------
    h2c = h2.astype(x_ref.dtype)
    wp = pp_ref[6:7, :].astype(x_ref.dtype)
    proj = jnp.einsum('of,tf->ot', wp, h2c, preferred_element_type=jnp.float32)
    proj = proj + pp_ref[7:8, 0:1]
    out = jnp.where(m_ref[0] != 0, proj, 0.0)
    o_ref[0] = out.astype(o_ref.dtype)


# --------------------------------------------------------------------------------------
# Wrapper
# --------------------------------------------------------------------------------------
def duration_predictor_forward(x, params, mask=None, *, kernel_size, t_tile_max=1024):
    """Fused DurationPredictor forward.

    x:      (B, T, enc_hidden)
    params: PyTorch-layout tensors:
            w1 (F, C_in, K), b1 (F,), ln1_g (F,), ln1_b (F,),
            w2 (F, F,  K),   b2 (F,), ln2_g (F,), ln2_b (F,),
            wp (1, F),       bp (1,)
    mask:   (B, T) bool, True = keep (optional)
    returns (B, T) in x.dtype
    """
    B, T, c_in = x.shape
    F, c_in_w, K = params["w1"].shape
    assert c_in == c_in_w and K == kernel_size
    assert K % 2 == 1, "same-padding DurationPredictor assumes odd kernel_size"
    pad = (K - 1) // 2                                   # get_same_padding(kernel_size)

    f32 = jnp.float32
    itemsize = jnp.dtype(x.dtype).itemsize

    # T tiling: lane-dense multiples of 128; big tiles amortize per-grid-step overhead.
    t_tile_max = _round_up(t_tile_max, 128)
    t_tile = _round_up(T, 128) if T <= t_tile_max else t_tile_max
    t_total = _round_up(T, t_tile)
    num_tiles = t_total // t_tile
    # Conv working row counts rounded to full sublane tiles.
    t_hid = _round_up(t_tile + 2 * pad, 8)               # h rows needed (conv2 halo)
    t_x = _round_up(t_hid + 2 * pad, 8)                  # x rows needed (conv1 halo)

    # Halo'd per-tile x windows in HBM (O(t_tile) VMEM per step, independent of T).
    x_len = (num_tiles - 1) * t_tile + t_x
    x_pad = jnp.pad(x, ((0, 0), (2 * pad, x_len - T - 2 * pad), (0, 0)))
    x_tiles = jnp.stack(
        [jax.lax.slice_in_dim(x_pad, g * t_tile, g * t_tile + t_x, axis=1)
         for g in range(num_tiles)], axis=1)             # (B, num_tiles, t_x, c_in)

    # Per-tap weight layout: w[k, i, o] = w_torch[o, i, k]; keep in model compute dtype.
    w1 = jnp.transpose(params["w1"], (2, 1, 0)).astype(x.dtype)    # (K, c_in, F)
    w2 = jnp.transpose(params["w2"], (2, 1, 0)).astype(x.dtype)    # (K, F,    F)

    # Pack all small per-channel vectors into one (8, F) f32 block.
    pp = jnp.stack([
        params["b1"].reshape(F).astype(f32),
        params["ln1_g"].reshape(F).astype(f32),
        params["ln1_b"].reshape(F).astype(f32),
        params["b2"].reshape(F).astype(f32),
        params["ln2_g"].reshape(F).astype(f32),
        params["ln2_b"].reshape(F).astype(f32),
        params["wp"].reshape(F).astype(f32),
        jnp.broadcast_to(params["bp"].reshape(1).astype(f32), (F,)),
    ], axis=0)                                            # (8, F)

    if mask is None:
        mask = jnp.ones((B, T), dtype=bool)
    mask_t = jnp.pad(mask.astype(x.dtype),
                     ((0, 0), (0, t_total - T))).reshape(B, 1, t_total)

    # VMEM budget: double-buffered blocks + f32 intermediates, 2x margin, capped 64 MiB.
    block_bytes = 2 * (t_x * c_in * itemsize
                       + K * c_in * F * itemsize
                       + K * F * F * itemsize
                       + 8 * F * 4
                       + 2 * t_tile * itemsize)
    interm_bytes = 4 * F * (3 * t_hid + 3 * t_tile)
    vmem_limit = int(min(64 << 20,
                         max(2 * (block_bytes + interm_bytes) + (4 << 20), 24 << 20)))

    kernel = functools.partial(_dp_kernel, t_tile=t_tile, t_hid=t_hid, pad=pad,
                               ksize=K, t_valid=T, eps=1e-5)

    grid_spec = pl.GridSpec(
        grid=(B, num_tiles),
        in_specs=[
            pl.BlockSpec((1, 1, t_x, c_in), lambda b, g: (b, g, 0, 0)),   # halo'd x tile
            pl.BlockSpec((K, c_in, F), lambda b, g: (0, 0, 0)),           # w1 (resident)
            pl.BlockSpec((K, F, F), lambda b, g: (0, 0, 0)),              # w2 (resident)
            pl.BlockSpec((8, F), lambda b, g: (0, 0)),                    # packed params
            pl.BlockSpec((1, 1, t_tile), lambda b, g: (b, 0, g)),         # mask
        ],
        out_specs=pl.BlockSpec((1, 1, t_tile), lambda b, g: (b, 0, g)),
    )

    out = pl.pallas_call(
        kernel,
        out_shape=jax.ShapeDtypeStruct((B, 1, t_total), x.dtype),
        grid_spec=grid_spec,
        compiler_params=pltpu.CompilerParams(
            dimension_semantics=("parallel", "parallel"),
            vmem_limit_bytes=vmem_limit),
    )(x_tiles, w1, w2, pp, mask_t)

    return out[:, 0, :T]


# --------------------------------------------------------------------------------------
# Pure-JAX reference (matches PyTorch eval-mode forward)
# --------------------------------------------------------------------------------------
def _conv1d_ref(x, w, b, pad):
    k = w.shape[2]
    t_out = x.shape[1] + 2 * pad - k + 1
    xp = jnp.pad(x, ((0, 0), (pad, pad), (0, 0)))
    wins = jnp.stack([xp[:, i:i + t_out, :] for i in range(k)], axis=2)   # (B,T,K,Cin)
    return jnp.einsum('btki,oik->bto', wins, w,
                      precision=jax.lax.Precision.HIGHEST) + b[None, None, :]


def _layernorm_ref(x, g, b, eps=1e-5):
    mu = jnp.mean(x, axis=-1, keepdims=True)
    var = jnp.mean(jnp.square(x - mu), axis=-1, keepdims=True)
    return (x - mu) * jax.lax.rsqrt(var + eps) * g + b


def _duration_predictor_ref(x, params, mask, kernel_size):
    pad = (kernel_size - 1) // 2
    h = jax.nn.relu(_conv1d_ref(x, params["w1"], params["b1"], pad))
    h = _layernorm_ref(h, params["ln1_g"], params["ln1_b"])
    h = jax.nn.relu(_conv1d_ref(h, params["w2"], params["b2"], pad))
    h = _layernorm_ref(h, params["ln2_g"], params["ln2_b"])
    out = jnp.einsum('btf,of->bto', h, params["wp"],
                     precision=jax.lax.Precision.HIGHEST)[..., 0] + params["bp"][0]
    return jnp.where(mask, out, 0.0)


def _make_params(key, enc, filt, k):
    ks = jax.random.split(key, 10)
    return {
        "w1": 0.1 * jax.random.normal(ks[0], (filt, enc, k), dtype=jnp.float32),
        "b1": 0.1 * jax.random.normal(ks[1], (filt,), dtype=jnp.float32),
        "ln1_g": 1.0 + 0.1 * jax.random.normal(ks[2], (filt,), dtype=jnp.float32),
        "ln1_b": 0.1 * jax.random.normal(ks[3], (filt,), dtype=jnp.float32),
        "w2": 0.1 * jax.random.normal(ks[4], (filt, filt, k), dtype=jnp.float32),
        "b2": 0.1 * jax.random.normal(ks[5], (filt,), dtype=jnp.float32),
        "ln2_g": 1.0 + 0.1 * jax.random.normal(ks[6], (filt,), dtype=jnp.float32),
        "ln2_b": 0.1 * jax.random.normal(ks[7], (filt,), dtype=jnp.float32),
        "wp": 0.1 * jax.random.normal(ks[8], (1, filt), dtype=jnp.float32),
        "bp": 0.1 * jax.random.normal(ks[9], (1,), dtype=jnp.float32),
    }


if __name__ == "__main__":
    fwd = jax.jit(duration_predictor_forward,
                  static_argnames=("kernel_size", "t_tile_max"))

    # --- check 1: small shapes, single tile --------------------------------------------
    B, T, ENC, FILT, K = 2, 16, 32, 32, 3
    key = jax.random.PRNGKey(0)
    kx, kp, _ = jax.random.split(key, 3)
    x = jax.random.normal(kx, (B, T, ENC), dtype=jnp.float32)
    params = _make_params(kp, ENC, FILT, K)
    lengths = jnp.array([T, T - 5], dtype=jnp.int32)
    mask = jnp.arange(T)[None, :] < lengths[:, None]                      # (B, T) bool

    out = jax.block_until_ready(fwd(x, params, mask, kernel_size=K))
    ref = _duration_predictor_ref(x, params, mask, K)
    assert out.shape == (B, T), out.shape
    err1 = float(jnp.max(jnp.abs(out - ref)))
    assert jnp.allclose(out, ref, atol=1e-4, rtol=1e-4), f"mismatch(1), max_err={err1}"

    # --- check 2: multi-tile path (halos across tile boundaries), K=5 ------------------
    B2, T2, K2 = 2, 300, 5
    key2 = jax.random.PRNGKey(1)
    kx2, kp2, _ = jax.random.split(key2, 3)
    x2 = jax.random.normal(kx2, (B2, T2, ENC), dtype=jnp.float32)
    params2 = _make_params(kp2, ENC, FILT, K2)
    lengths2 = jnp.array([T2, T2 - 37], dtype=jnp.int32)
    mask2 = jnp.arange(T2)[None, :] < lengths2[:, None]

    out2 = jax.block_until_ready(
        fwd(x2, params2, mask2, kernel_size=K2, t_tile_max=128))
    ref2 = _duration_predictor_ref(x2, params2, mask2, K2)
    assert out2.shape == (B2, T2), out2.shape
    err2 = float(jnp.max(jnp.abs(out2 - ref2)))
    assert jnp.allclose(out2, ref2, atol=1e-4, rtol=1e-4), f"mismatch(2), max_err={err2}"

    print("KERNEL_OK")
</pallas_src>

<mosaic_0001>
module attributes {stable_mosaic.version = 11 : i64} {
  func.func @_dp_kernel(%arg0: i32, %arg1: i32, %arg2: memref<1x1x144x32xf32, #tpu.memory_space<vmem>>, %arg3: memref<3x32x32xf32, #tpu.memory_space<vmem>>, %arg4: memref<3x32x32xf32, #tpu.memory_space<vmem>>, %arg5: memref<8x32xf32, #tpu.memory_space<vmem>>, %arg6: memref<1x1x128xf32, #tpu.memory_space<vmem>>, %arg7: memref<1x1x128xf32, #tpu.memory_space<vmem>>) attributes {dimension_semantics = [#tpu.dimension_semantics<parallel>, #tpu.dimension_semantics<parallel>], iteration_bounds = array<i64: 2, 1>, scalar_prefetch = 0 : i64, scratch_operands = 0 : i64, tpu.core_type = #tpu.core_type<tc>, window_params = [{transform_indices = @transform_0, window_bounds = array<i64: 1, 1, 144, 32>}, {pipeline_mode = #tpu.pipeline_mode<synchronous>, transform_indices = @transform_1, window_bounds = array<i64: 3, 32, 32>}, {pipeline_mode = #tpu.pipeline_mode<synchronous>, transform_indices = @transform_2, window_bounds = array<i64: 3, 32, 32>}, {pipeline_mode = #tpu.pipeline_mode<synchronous>, transform_indices = @transform_3, window_bounds = array<i64: 8, 32>}, {transform_indices = @transform_4, window_bounds = array<i64: 1, 1, 128>}, {transform_indices = @transform_5, window_bounds = array<i64: 1, 1, 128>}]} {
    %c128_i32 = arith.constant 128 : i32
    %0 = arith.muli %arg1, %c128_i32 : i32
    %c0 = arith.constant 0 : index
    %c0_0 = arith.constant 0 : index
    %c0_1 = arith.constant 0 : index
    %c0_2 = arith.constant 0 : index
    %1 = vector.load %arg2[%c0, %c0_0, %c0_1, %c0_2] : memref<1x1x144x32xf32, #tpu.memory_space<vmem>>, vector<1x1x144x32xf32>
    %2 = vector.shape_cast %1 : vector<1x1x144x32xf32> to vector<144x32xf32>
    %3 = vector.extract_strided_slice %2 {offsets = [0, 0], sizes = [136, 32], strides = [1, 1]} : vector<144x32xf32> to vector<136x32xf32>
    %c0_3 = arith.constant 0 : index
    %c0_4 = arith.constant 0 : index
    %c0_5 = arith.constant 0 : index
    %4 = vector.load %arg3[%c0_3, %c0_4, %c0_5] : memref<3x32x32xf32, #tpu.memory_space<vmem>>, vector<1x32x32xf32>
    %5 = vector.shape_cast %4 : vector<1x32x32xf32> to vector<32x32xf32>
    %cst = arith.constant dense<0.000000e+00> : vector<136x32xf32>
    %6 = tpu.matmul %3, %5, %cst {dimension_numbers = #tpu.dot_dimension_numbers<[1], [0], [0], [1], [0, 0, 1, 1], [], []>} : vector<136x32xf32>, vector<32x32xf32>, vector<136x32xf32> -> vector<136x32xf32>
    %7 = vector.extract_strided_slice %2 {offsets = [1, 0], sizes = [136, 32], strides = [1, 1]} : vector<144x32xf32> to vector<136x32xf32>
    %c1 = arith.constant 1 : index
    %c0_6 = arith.constant 0 : index
    %c0_7 = arith.constant 0 : index
    %8 = vector.load %arg3[%c1, %c0_6, %c0_7] : memref<3x32x32xf32, #tpu.memory_space<vmem>>, vector<1x32x32xf32>
    %9 = vector.shape_cast %8 : vector<1x32x32xf32> to vector<32x32xf32>
    %cst_8 = arith.constant dense<0.000000e+00> : vector<136x32xf32>
    %10 = tpu.matmul %7, %9, %cst_8 {dimension_numbers = #tpu.dot_dimension_numbers<[1], [0], [0], [1], [0, 0, 1, 1], [], []>} : vector<136x32xf32>, vector<32x32xf32>, vector<136x32xf32> -> vector<136x32xf32>
    %11 = arith.addf %6, %10 : vector<136x32xf32>
    %12 = vector.extract_strided_slice %2 {offsets = [2, 0], sizes = [136, 32], strides = [1, 1]} : vector<144x32xf32> to vector<136x32xf32>
    %c2 = arith.constant 2 : index
    %c0_9 = arith.constant 0 : index
    %c0_10 = arith.constant 0 : index
    %13 = vector.load %arg3[%c2, %c0_9, %c0_10] : memref<3x32x32xf32, #tpu.memory_space<vmem>>, vector<1x32x32xf32>
    %14 = vector.shape_cast %13 : vector<1x32x32xf32> to vector<32x32xf32>
    %cst_11 = arith.constant dense<0.000000e+00> : vector<136x32xf32>
    %15 = tpu.matmul %12, %14, %cst_11 {dimension_numbers = #tpu.dot_dimension_numbers<[1], [0], [0], [1], [0, 0, 1, 1], [], []>} : vector<136x32xf32>, vector<32x32xf32>, vector<136x32xf32> -> vector<136x32xf32>
    %16 = arith.addf %11, %15 : vector<136x32xf32>
    %c0_12 = arith.constant 0 : index
    %c0_13 = arith.constant 0 : index
    %17 = vector.load %arg5[%c0_12, %c0_13] : memref<8x32xf32, #tpu.memory_space<vmem>>, vector<1x32xf32>
    %18 = vector.broadcast %17 : vector<1x32xf32> to vector<136x32xf32>
    %19 = arith.addf %16, %18 : vector<136x32xf32>
    %cst_14 = arith.constant 0.000000e+00 : f32
    %20 = vector.broadcast %cst_14 : f32 to vector<136x32xf32>
    %21 = arith.maximumf %19, %20 : vector<136x32xf32>
    %cst_15 = arith.constant dense<0.000000e+00> : vector<136xf32>
    %22 = vector.multi_reduction <add>, %21, %cst_15 [1] : vector<136x32xf32> to vector<136xf32>
    %23 = vector.shape_cast %22 : vector<136xf32> to vector<136x1xf32>
    %cst_16 = arith.constant 3.200000e+01 : f32
    %24 = vector.broadcast %cst_16 : f32 to vector<136x1xf32>
    %25 = arith.divf %23, %24 : vector<136x1xf32>
    %26 = arith.mulf %21, %21 : vector<136x32xf32>
    %cst_17 = arith.constant dense<0.000000e+00> : vector<136xf32>
    %27 = vector.multi_reduction <add>, %26, %cst_17 [1] : vector<136x32xf32> to vector<136xf32>
    %28 = vector.shape_cast %27 : vector<136xf32> to vector<136x1xf32>
    %cst_18 = arith.constant 3.200000e+01 : f32
    %29 = vector.broadcast %cst_18 : f32 to vector<136x1xf32>
    %30 = arith.divf %28, %29 : vector<136x1xf32>
    %31 = vector.broadcast %25 : vector<136x1xf32> to vector<136x32xf32>
    %32 = arith.subf %21, %31 : vector<136x32xf32>
    %33 = arith.mulf %25, %25 : vector<136x1xf32>
    %34 = arith.subf %30, %33 : vector<136x1xf32>
    %cst_19 = arith.constant 9.99999974E-6 : f32
    %35 = vector.broadcast %cst_19 : f32 to vector<136x1xf32>
    %36 = arith.addf %34, %35 : vector<136x1xf32>
    %37 = math.rsqrt %36 : vector<136x1xf32>
    %38 = vector.broadcast %37 : vector<136x1xf32> to vector<136x32xf32>
    %39 = arith.mulf %32, %38 : vector<136x32xf32>
    %c1_20 = arith.constant 1 : index
    %c0_21 = arith.constant 0 : index
    %40 = vector.load %arg5[%c1_20, %c0_21] : memref<8x32xf32, #tpu.memory_space<vmem>>, vector<1x32xf32>
    %41 = vector.broadcast %40 : vector<1x32xf32> to vector<136x32xf32>
    %42 = arith.mulf %39, %41 : vector<136x32xf32>
    %c2_22 = arith.constant 2 : index
    %c0_23 = arith.constant 0 : index
    %43 = vector.load %arg5[%c2_22, %c0_23] : memref<8x32xf32, #tpu.memory_space<vmem>>, vector<1x32xf32>
    %44 = vector.broadcast %43 : vector<1x32xf32> to vector<136x32xf32>
    %45 = arith.addf %42, %44 : vector<136x32xf32>
    %46 = tpu.iota {dimensions = array<i32: 0>} : vector<136x1xi32>
    %c1_i32 = arith.constant 1 : i32
    %47 = arith.subi %0, %c1_i32 : i32
    %48 = vector.broadcast %47 : i32 to vector<136x1xi32>
    %49 = arith.addi %46, %48 : vector<136x1xi32>
    %c0_i32 = arith.constant 0 : i32
    %50 = vector.broadcast %c0_i32 : i32 to vector<136x1xi32>
    %51 = arith.cmpi sge, %49, %50 : vector<136x1xi32>
    %c16_i32 = arith.constant 16 : i32
    %52 = vector.broadcast %c16_i32 : i32 to vector<136x1xi32>
    %53 = arith.cmpi slt, %49, %52 : vector<136x1xi32>
    %54 = arith.andi %51, %53 : vector<136x1xi1>
    %cst_24 = arith.constant 0.000000e+00 : f32
    %55 = vector.shape_cast %54 : vector<136x1xi1> to vector<136x1xi1>
    %56 = vector.broadcast %55 : vector<136x1xi1> to vector<136x32xi1>
    %57 = vector.broadcast %cst_24 : f32 to vector<136x32xf32>
    %58 = arith.select %56, %45, %57 : vector<136x32xi1>, vector<136x32xf32>
    %59 = vector.extract_strided_slice %58 {offsets = [0, 0], sizes = [128, 32], strides = [1, 1]} : vector<136x32xf32> to vector<128x32xf32>
    %c0_25 = arith.constant 0 : index
    %c0_26 = arith.constant 0 : index
    %c0_27 = arith.constant 0 : index
    %60 = vector.load %arg4[%c0_25, %c0_26, %c0_27] : memref<3x32x32xf32, #tpu.memory_space<vmem>>, vector<1x32x32xf32>
    %61 = vector.shape_cast %60 : vector<1x32x32xf32> to vector<32x32xf32>
    %cst_28 = arith.constant dense<0.000000e+00> : vector<128x32xf32>
    %62 = tpu.matmul %59, %61, %cst_28 {dimension_numbers = #tpu.dot_dimension_numbers<[1], [0], [0], [1], [0, 0, 1, 1], [], []>} : vector<128x32xf32>, vector<32x32xf32>, vector<128x32xf32> -> vector<128x32xf32>
    %63 = vector.extract_strided_slice %58 {offsets = [1, 0], sizes = [128, 32], strides = [1, 1]} : vector<136x32xf32> to vector<128x32xf32>
    %c1_29 = arith.constant 1 : index
    %c0_30 = arith.constant 0 : index
    %c0_31 = arith.constant 0 : index
    %64 = vector.load %arg4[%c1_29, %c0_30, %c0_31] : memref<3x32x32xf32, #tpu.memory_space<vmem>>, vector<1x32x32xf32>
    %65 = vector.shape_cast %64 : vector<1x32x32xf32> to vector<32x32xf32>
    %cst_32 = arith.constant dense<0.000000e+00> : vector<128x32xf32>
    %66 = tpu.matmul %63, %65, %cst_32 {dimension_numbers = #tpu.dot_dimension_numbers<[1], [0], [0], [1], [0, 0, 1, 1], [], []>} : vector<128x32xf32>, vector<32x32xf32>, vector<128x32xf32> -> vector<128x32xf32>
    %67 = arith.addf %62, %66 : vector<128x32xf32>
    %68 = vector.extract_strided_slice %58 {offsets = [2, 0], sizes = [128, 32], strides = [1, 1]} : vector<136x32xf32> to vector<128x32xf32>
    %c2_33 = arith.constant 2 : index
    %c0_34 = arith.constant 0 : index
    %c0_35 = arith.constant 0 : index
    %69 = vector.load %arg4[%c2_33, %c0_34, %c0_35] : memref<3x32x32xf32, #tpu.memory_space<vmem>>, vector<1x32x32xf32>
    %70 = vector.shape_cast %69 : vector<1x32x32xf32> to vector<32x32xf32>
    %cst_36 = arith.constant dense<0.000000e+00> : vector<128x32xf32>
    %71 = tpu.matmul %68, %70, %cst_36 {dimension_numbers = #tpu.dot_dimension_numbers<[1], [0], [0], [1], [0, 0, 1, 1], [], []>} : vector<128x32xf32>, vector<32x32xf32>, vector<128x32xf32> -> vector<128x32xf32>
    %72 = arith.addf %67, %71 : vector<128x32xf32>
    %c3 = arith.constant 3 : index
    %c0_37 = arith.constant 0 : index
    %73 = vector.load %arg5[%c3, %c0_37] : memref<8x32xf32, #tpu.memory_space<vmem>>, vector<1x32xf32>
    %74 = vector.broadcast %73 : vector<1x32xf32> to vector<128x32xf32>
    %75 = arith.addf %72, %74 : vector<128x32xf32>
    %cst_38 = arith.constant 0.000000e+00 : f32
    %76 = vector.broadcast %cst_38 : f32 to vector<128x32xf32>
    %77 = arith.maximumf %75, %76 : vector<128x32xf32>
    %cst_39 = arith.constant dense<0.000000e+00> : vector<128xf32>
    %78 = vector.multi_reduction <add>, %77, %cst_39 [1] : vector<128x32xf32> to vector<128xf32>
    %79 = vector.shape_cast %78 : vector<128xf32> to vector<128x1xf32>
    %cst_40 = arith.constant 3.200000e+01 : f32
    %80 = vector.broadcast %cst_40 : f32 to vector<128x1xf32>
    %81 = arith.divf %79, %80 : vector<128x1xf32>
    %82 = arith.mulf %77, %77 : vector<128x32xf32>
    %cst_41 = arith.constant dense<0.000000e+00> : vector<128xf32>
    %83 = vector.multi_reduction <add>, %82, %cst_41 [1] : vector<128x32xf32> to vector<128xf32>
    %84 = vector.shape_cast %83 : vector<128xf32> to vector<128x1xf32>
    %cst_42 = arith.constant 3.200000e+01 : f32
    %85 = vector.broadcast %cst_42 : f32 to vector<128x1xf32>
    %86 = arith.divf %84, %85 : vector<128x1xf32>
    %87 = vector.broadcast %81 : vector<128x1xf32> to vector<128x32xf32>
    %88 = arith.subf %77, %87 : vector<128x32xf32>
    %89 = arith.mulf %81, %81 : vector<128x1xf32>
    %90 = arith.subf %86, %89 : vector<128x1xf32>
    %cst_43 = arith.constant 9.99999974E-6 : f32
    %91 = vector.broadcast %cst_43 : f32 to vector<128x1xf32>
    %92 = arith.addf %90, %91 : vector<128x1xf32>
    %93 = math.rsqrt %92 : vector<128x1xf32>
    %94 = vector.broadcast %93 : vector<128x1xf32> to vector<128x32xf32>
    %95 = arith.mulf %88, %94 : vector<128x32xf32>
    %c4 = arith.constant 4 : index
    %c0_44 = arith.constant 0 : index
    %96 = vector.load %arg5[%c4, %c0_44] : memref<8x32xf32, #tpu.memory_space<vmem>>, vector<1x32xf32>
    %97 = vector.broadcast %96 : vector<1x32xf32> to vector<128x32xf32>
    %98 = arith.mulf %95, %97 : vector<128x32xf32>
    %c5 = arith.constant 5 : index
    %c0_45 = arith.constant 0 : index
    %99 = vector.load %arg5[%c5, %c0_45] : memref<8x32xf32, #tpu.memory_space<vmem>>, vector<1x32xf32>
    %100 = vector.broadcast %99 : vector<1x32xf32> to vector<128x32xf32>
    %101 = arith.addf %98, %100 : vector<128x32xf32>
    %c6 = arith.constant 6 : index
    %c0_46 = arith.constant 0 : index
    %102 = vector.load %arg5[%c6, %c0_46] : memref<8x32xf32, #tpu.memory_space<vmem>>, vector<1x32xf32>
    "tpu.trace_start"() <{level = 10 : i32, message = "of,tf->ot"}> : () -> ()
    %cst_47 = arith.constant dense<0.000000e+00> : vector<1x128xf32>
    %103 = tpu.matmul %102, %101, %cst_47 {dimension_numbers = #tpu.dot_dimension_numbers<[1], [1], [0], [0], [0, 0, 1, 0], [], []>} : vector<1x32xf32>, vector<128x32xf32>, vector<1x128xf32> -> vector<1x128xf32>
    "tpu.trace_stop"() : () -> ()
    %c7 = arith.constant 7 : index
    %c0_48 = arith.constant 0 : index
    %104 = vector.load %arg5[%c7, %c0_48] : memref<8x32xf32, #tpu.memory_space<vmem>>, vector<1x1xf32>
    %105 = vector.broadcast %104 : vector<1x1xf32> to vector<1x128xf32>
    %106 = arith.addf %103, %105 : vector<1x128xf32>
    %c0_49 = arith.constant 0 : index
    %c0_50 = arith.constant 0 : index
    %c0_51 = arith.constant 0 : index
    %107 = vector.load %arg6[%c0_49, %c0_50, %c0_51] : memref<1x1x128xf32, #tpu.memory_space<vmem>>, vector<1x1x128xf32>
    %108 = vector.shape_cast %107 : vector<1x1x128xf32> to vector<1x128xf32>
    %cst_52 = arith.constant 0.000000e+00 : f32
    %109 = vector.broadcast %cst_52 : f32 to vector<1x128xf32>
    %110 = arith.cmpf one, %108, %109 : vector<1x128xf32>
    %cst_53 = arith.constant 0.000000e+00 : f32
    %111 = vector.broadcast %cst_53 : f32 to vector<1x128xf32>
    %112 = arith.select %110, %106, %111 : vector<1x128xi1>, vector<1x128xf32>
    %c0_54 = arith.constant 0 : index
    %c0_55 = arith.constant 0 : index
    %c0_56 = arith.constant 0 : index
    %113 = vector.load %arg7[%c0_54, %c0_55, %c0_56] : memref<1x1x128xf32, #tpu.memory_space<vmem>>, vector<1x1x128xf32>
    %114 = vector.shape_cast %113 : vector<1x1x128xf32> to vector<1x128xf32>
    %115 = vector.shape_cast %112 : vector<1x128xf32> to vector<1x1x128xf32>
    tpu.vector_store %arg7[%c0_54, %c0_55, %c0_56], %115 {strides = array<i32>} : memref<1x1x128xf32, #tpu.memory_space<vmem>>, vector<1x1x128xf32>,
    return
  }
  func.func @transform_0(%arg0: i32, %arg1: i32) -> (i32, i32, i32, i32) {
    %c0_i32 = arith.constant 0 : i32
    %c0_i32_0 = arith.constant 0 : i32
    %c0_i32_1 = arith.constant 0 : i32
    return %arg0, %arg1, %c0_i32, %c0_i32_0 : i32, i32, i32, i32
  }
  func.func @transform_1(%arg0: i32, %arg1: i32) -> (i32, i32, i32) {
    %c0_i32 = arith.constant 0 : i32
    %c0_i32_0 = arith.constant 0 : i32
    %c0_i32_1 = arith.constant 0 : i32
    %c0_i32_2 = arith.constant 0 : i32
    return %c0_i32, %c0_i32_0, %c0_i32_1 : i32, i32, i32
  }
  func.func @transform_2(%arg0: i32, %arg1: i32) -> (i32, i32, i32) {
    %c0_i32 = arith.constant 0 : i32
    %c0_i32_0 = arith.constant 0 : i32
    %c0_i32_1 = arith.constant 0 : i32
    %c0_i32_2 = arith.constant 0 : i32
    return %c0_i32, %c0_i32_0, %c0_i32_1 : i32, i32, i32
  }
  func.func @transform_3(%arg0: i32, %arg1: i32) -> (i32, i32) {
    %c0_i32 = arith.constant 0 : i32
    %c0_i32_0 = arith.constant 0 : i32
    %c0_i32_1 = arith.constant 0 : i32
    return %c0_i32, %c0_i32_0 : i32, i32
  }
  func.func @transform_4(%arg0: i32, %arg1: i32) -> (i32, i32, i32) {
    %c0_i32 = arith.constant 0 : i32
    %c0_i32_0 = arith.constant 0 : i32
    return %arg0, %c0_i32, %arg1 : i32, i32, i32
  }
  func.func @transform_5(%arg0: i32, %arg1: i32) -> (i32, i32, i32) {
    %c0_i32 = arith.constant 0 : i32
    %c0_i32_0 = arith.constant 0 : i32
    return %arg0, %c0_i32, %arg1 : i32, i32, i32
  }
}

</mosaic_0001>

<bundles_post_ra>
// kernel: duration_predictor_forward.1
= control target key start
LH: loop header
LB: loop body
LE: loop exit
PB: predicated region body
PF: predicated region fallthrough
CT: control target
= control target key end

     0   :  { %10 = vsyncpa [#allocation3], 0  ;;  %s4346_s0 = inlined_call_operand.vmem [shape: f32[2,1,144,32], index: 0, kind: input, shape index: {}]   ;;  %s4347_s1 = inlined_call_operand.vmem [shape: f32[3,32,32], index: 1, kind: input, shape index: {}]   ;;  %s4348_s2 = inlined_call_operand.vmem [shape: f32[3,32,32], index: 2, kind: input, shape index: {}]   ;;  %s4349_s3 = inlined_call_operand.vmem [shape: f32[8,32], index: 3, kind: input, shape index: {}]   ;;  %s4350_s4 = inlined_call_operand.vmem [shape: f32[2,1,128], index: 4, kind: input, shape index: {}]   ;;  %s4351_s5 = inlined_call_operand.hbm [shape: f32[2,1,128], index: 5, kind: output, shape index: {}]  }
   0x1   :  { %12 = vsyncpa [#allocation3 + $0x1], 0  ;;  %s3454_s18 = smov 0   ;;  %s3456_s19 = smov 0  }
   0x2   :  { %s3458_s20 = smov 0   ;;  %s3460_s21 = smov 0  }
   0x3   :  { %s3462_s22 = smov 0   ;;  %s3464_s23 = smov 0  }
   0x4 LB: > { %s2640_s24 = sadd.s32 4294967295, %s3418_s23   ;;  %s2641_s25 = sadd.s32 4294967294, %s3418_s23   ;;  %s3418_s23 = sphi %s3464_s23, %s18_s23   ;;  %s3414_s22 = sphi %s3462_s22, %s4358_s22   ;;  %s3410_s21 = sphi %s3460_s21, %s4357_s21   ;;  %s3406_s20 = sphi %s3458_s20, %s4356_s20   ;;  %s3402_s19 = sphi %s3456_s19, %s4355_s19   ;;  %s3398_s18 = sphi %s3454_s18, %s4354_s18  }
   0x5   : > { %s30_s26 = sadd.s32 1, %s3414_s22  ;;  %s158_s27 = sadd.s32 1, %s3406_s20 }
   0x6   : > { %p32_p0 = scmp.ge.s32.totalorder %s30_s26, 2  ;;  %p168_p1 = scmp.ne.s32.totalorder %s3406_s20, %s3402_s19 }
   0x7   : > { %p169_p2 = scmp.eq.s32.totalorder %s2640_s24, 1  ;;  %p174_p3 = scmp.ne.s32.totalorder %s3402_s19, %s3398_s18 }
   0x8   : > { %s4360_s26 = smov (%p32_p0, %s30_s26), 0  ;;  %p175_p5 = scmp.eq.s32.totalorder %s2641_s25, 1 }
   0x9   : > { %p3494_p4 = por %p169_p2, %p168_p1  ;;  %s153_s29 = ssub.s32 %s3414_s22, %s4360_s26 }
   0xa   : > { %p2644_p6 = scmp.ge.s32.totalorder %s3418_s23, 1  ;;  %p156_p7 = scmp.eq.s32.totalorder %s153_s29, 0 }
   0xb   : > { %p3501_p8 = por %p175_p5, %p174_p3  ;;  %p223_p9 = scmp.lt.s32.totalorder %s3418_s23, 3 }
   0xc   : > { %s3507_s6 = scalar_select %p156_p7, %s3406_s20, %s158_s27  }
   0xd   : > { %p224_p10 = pnand %p2644_p6, %p223_p9 }
   0xe   : > { %p260_p11 = scmp.lt.s32.totalorder (!%p224_p10), %s3410_s21, 1  ;;  %s258_s7 = sand.u32 (!%p224_p10), 1, %s3402_s19  }
   0xf   : > { %227 = sbr.rel (%p224_p10) target bundleno = 1222 (0x4c6), region = 40  ;;  %s2771_s13 = sshll.u32 (!%p224_p10), %s3410_s21, 4 }
  0x10   : > { %s259_s14 = scalar_lea.vmem (!%p224_p10), [#allocation2], %s258_s7  ;;  %s4306_s17 = scalar_lea.hbm (!%p224_p10), %s4351_s5, %s2771_s13 }
  0x11   : > { %s2555_s15 = sshll.u32 (!%p224_p10), %s259_s14, 4  ;;  %s2542_s24 = scalar_lea.sflag (!%p224_p10), [#allocation3], %s258_s7  ;;  %s2556_s15 = int_to_ptr.vmem [resolvable:$true] %s2555_s15 }
  0x14   : > { %v2649_v0 = vld [vmem:[%s4347_s1 + $0x38] sm:$0xff]  ;;  %v3420_v1 = vmov 0.0   ;;  %v2648_v2 = vld [vmem:[%s4347_s1 + $0x30] sm:$0xff]  ;;  %vm3421_vm0 = vmmov 0   ;;  %s3520_s11 = scalar_select %p260_p11, %s3410_s21, 1  ;;  %v2647_v4 = vld [vmem:[%s4347_s1 + $0x28] sm:$0xff] }
  0x15   : > { %2914 = vmatprep.subr.mxu0 %v3420_v1  ;;  %2922 = vmatprep.mubr.msk.f32.mxu0 %vm3421_vm0, %v3420_v1  ;;  %v297_v3 = vld [vmem:[%s4347_s1 + $0x18] sm:$0xff]  ;;  %v296_v5 = vld [vmem:[%s4347_s1 + $0x10] sm:$0xff]  ;;  %v2646_v6 = vld [vmem:[%s4347_s1 + $0x20] sm:$0xff]  ;;  %vm321_vm1 = vcmask 1046528   ;;  %vm357_vm2 = vcmask 261120   ;;  %vm731_vm3 = vcmask 1045504  }
  0x16   : > { %2915 = vmatpush3.msra.mxu0 %v2649_v0  ;;  %3222 = vmatprep.subr.mxu1 %v3420_v1  ;;  %s3230_s16 = smul.u32 144, %s3520_s11  ;;  %v295_v7 = vld [vmem:[%s4347_s1 + $0x8] sm:$0xff]  ;;  %v294_v13 = vld [vmem:[%s4347_s1] sm:$0xff]  ;;  %v2687_v62 = vld [vmem:[%s4347_s1 + $0x58] sm:$0xff]  ;;  %s274_s12 = scalar_lea.vmem %s4350_s4, %s3520_s11 }
  0x17   : > { %2916 = vmatprep.subr.mxu0 %v3420_v1  ;;  %3226 = vmatpush3.msra.mxu1 %v297_v3  ;;  %v2686_v63 = vld [vmem:[%s4347_s1 + $0x50] sm:$0xff]  ;;  %v2685_v0 = vld [vmem:[%s4347_s1 + $0x48] sm:$0xff]  ;;  %s3342_s11 = scalar_lea.vmem %s2556_s15, 16  ;;  %s3423_s21 = smov [#allocation2]  }
  0x18   : > { %2917 = vmatpush3.msra.mxu0 %v2648_v2  ;;  %3223 = vmatprep.subr.mxu1 %v3420_v1  ;;  %s3542_s8 = scalar_lea.vmem %s4346_s0, %s3230_s16  ;;  %v2684_v2 = vld [vmem:[%s4347_s1 + $0x40] sm:$0xff]  ;;  %p3343_p12 = scmp.ne.s32.totalorder %s2556_s15, %s3342_s11 }
  0x19   : > { %2918 = vmatprep.subr.mxu0 %v3420_v1  ;;  %3227 = vmatpush3.msra.mxu1 %v296_v5  ;;  %v3550_v8 = vld [vmem:[%s3542_s8] sm:$0xff]  ;;  %v3553_v9 = vld [vmem:[%s3542_s8 + $0x8] sm:$0xff]  ;;  %v3556_v10 = vld [vmem:[%s3542_s8 + $0x10] sm:$0xff]  ;;  %s3346_s25 = sshll.u32 %s3423_s21, 4  ;;  %s3347_s25 = int_to_ptr.vmem [resolvable:$false] %s3346_s25 }
  0x1a   : > { %2919 = vmatpush3.msra.mxu0 %v2647_v4  ;;  %3224 = vmatprep.subr.mxu1 %v3420_v1  ;;  %v322_v11 = vrot.slane %v3550_v8, 1  ;;  %v323_v12 = vrot.slane %v3553_v9, 1  ;;  %v325_v14 = vrot.slane %v3556_v10, 1  ;;  %v3567_v15 = vld [vmem:[%s3542_s8 + $0x18] sm:$0xff]  ;;  %v280_v19 = vld [vmem:[%s3542_s8 + $0x20] sm:$0xff]  ;;  %v281_v22 = vld [vmem:[%s3542_s8 + $0x28] sm:$0xff]  ;;  %p3344_p13 = pnand %p3343_p12, %p3494_p4  ;;  %p3349_p1 = scmp.lt.s32.totalorder %s2556_s15, %s3347_s25 }
  0x1b   : > { %2920 = vmatprep.subr.mxu0 %v3420_v1  ;;  %3228 = vmatpush3.msra.mxu1 %v295_v7  ;;  %v327_v18 = vrot.slane %v3567_v15, 1  ;;  %v329_v21 = vrot.slane %v280_v19, 1  ;;  %v331_v24 = vrot.slane %v281_v22, 1  ;;  %v282_v25 = vld [vmem:[%s3542_s8 + $0x30] sm:$0xff]  ;;  %v283_v28 = vld [vmem:[%s3542_s8 + $0x38] sm:$0xff]  ;;  %v284_v31 = vld [vmem:[%s3542_s8 + $0x40] sm:$0xff] }
  0x1c   : > { %2921 = vmatpush3.msra.mxu0 %v2646_v6  ;;  %3225 = vmatprep.subr.mxu1 %v3420_v1  ;;  %v324_v16 = vsel %vm321_vm1, %v322_v11, %v323_v12  ;;  %v326_v17 = vsel %vm321_vm1, %v323_v12, %v325_v14  ;;  %v333_v27 = vrot.slane %v282_v25, 1  ;;  %v335_v30 = vrot.slane %v283_v28, 1  ;;  %v285_v34 = vld [vmem:[%s3542_s8 + $0x48] sm:$0xff]  ;;  %v286_v37 = vld [vmem:[%s3542_s8 + $0x50] sm:$0xff]  ;;  %v287_v40 = vld [vmem:[%s3542_s8 + $0x58] sm:$0xff]  ;;  %p3345_p0 = pneg %p3344_p13  ;;  %s3348_s27 = scalar_lea.vmem %s3347_s25, 32 }
  0x1d   : > { %2973 = vmatprep.subr.mxu0 %v3420_v1  ;;  %3229 = vmatpush3.msra.mxu1 %v294_v13  ;;  %v328_v20 = vsel %vm321_vm1, %v325_v14, %v327_v18  ;;  %v330_v23 = vsel %vm321_vm1, %v327_v18, %v329_v21  ;;  %v332_v26 = vsel %vm321_vm1, %v329_v21, %v331_v24  ;;  %v337_v33 = vrot.slane %v284_v31, 1  ;;  %v288_v43 = vld [vmem:[%s3542_s8 + $0x60] sm:$0xff]  ;;  %v289_v46 = vld [vmem:[%s3542_s8 + $0x68] sm:$0xff]  ;;  %v290_v49 = vld [vmem:[%s3542_s8 + $0x70] sm:$0xff]  ;;  %p3350_p2 = scmp.lt.s32.totalorder %s3348_s27, %s3342_s11 }
  0x1e   : > { %2990 = vmatprep.mubr.msk.f32.mxu1 %vm3421_vm0, %v3420_v1  ;;  %2923 = vmatmul.mubr.msk.f32.vlgmr.msra.gmra.mxu0 %vm357_vm2, %v324_v16  ;;  %v334_v29 = vsel %vm321_vm1, %v331_v24, %v333_v27  ;;  %v336_v32 = vsel %vm321_vm1, %v333_v27, %v335_v30  ;;  %v339_v36 = vrot.slane %v285_v34, 1  ;;  %v341_v39 = vrot.slane %v286_v37, 1  ;;  %v291_v52 = vld [vmem:[%s3542_s8 + $0x78] sm:$0xff]  ;;  %v292_v55 = vld [vmem:[%s3542_s8 + $0x80] sm:$0xff]  ;;  %v293_v58 = vld [vmem:[%s3542_s8 + $0x88] sm:$0xff] }
  0x1f   : > { %2991 = vmatmul.mubr.msk.f32.vlgmr.msra.gmra.mxu1 %vm357_vm2, %v3567_v15  ;;  %2925 = vmatprep.mubr.msk.f32.mxu0 %vm3421_vm0, %v3420_v1  ;;  %v338_v35 = vsel %vm321_vm1, %v335_v30, %v337_v33  ;;  %v343_v42 = vrot.slane %v287_v40, 1  ;;  %v345_v45 = vrot.slane %v288_v43, 1  ;;  %v347_v48 = vrot.slane %v289_v46, 1  ;;  %p3351_p3 = por %p3350_p2, %p3349_p1 }
  0x20   : > { %2974 = vmatpush3.msra.mxu0 %v297_v3  ;;  %2993 = vmatprep.mubr.msk.f32.mxu1 %vm3421_vm0, %v3420_v1  ;;  %v340_v38 = vsel %vm321_vm1, %v337_v33, %v339_v36  ;;  %v342_v41 = vsel %vm321_vm1, %v339_v36, %v341_v39  ;;  %v349_v51 = vrot.slane %v290_v49, 1  ;;  %v351_v54 = vrot.slane %v291_v52, 1 }
  0x21   : > { %2975 = vmatprep.subr.mxu0 %v3420_v1  ;;  %v344_v44 = vsel %vm321_vm1, %v341_v39, %v343_v42  ;;  %v346_v47 = vsel %vm321_vm1, %v343_v42, %v345_v45  ;;  %v348_v50 = vsel %vm321_vm1, %v345_v45, %v347_v48  ;;  %v353_v57 = vrot.slane %v292_v55, 1  ;;  %p3352_p5 = pnand %p3351_p3, %p3345_p0 }
  0x22   : > { %2976 = vmatpush3.msra.mxu0 %v296_v5  ;;  %v350_v53 = vsel %vm321_vm1, %v347_v48, %v349_v51  ;;  %v352_v56 = vsel %vm321_vm1, %v349_v51, %v351_v54  ;;  %v355_v60 = vrot.slane %v293_v58, 1  ;;  %v732_v3 = vrot.slane %v3550_v8, 2 }
  0x23   : > { %2926 = vmatmul.mubr.msk.f32.gmra.mxu0 %vm357_vm2, %v326_v17  ;;  %2977 = vmatprep.subr.mxu0 %v3420_v1  ;;  %v354_v59 = vsel %vm321_vm1, %v351_v54, %v353_v57  ;;  %v733_v4 = vrot.slane %v3553_v9, 2  ;;  %v735_v6 = vrot.slane %v3556_v10, 2 }
  0x24   : > { %2928 = vmatprep.mubr.msk.f32.mxu0 %vm3421_vm0, %v3420_v1  ;;  %2978 = vmatpush3.msra.mxu0 %v295_v7  ;;  %v356_v61 = vsel %vm321_vm1, %v353_v57, %v355_v60 }
  0x25   : > { %2979 = vmatprep.subr.mxu0 %v3420_v1  ;;  %2994 = vmatmul.mubr.msk.f32.gmra.mxu1 %vm357_vm2, %v280_v19  ;;  %v734_v5 = vsel %vm731_vm3, %v732_v3, %v733_v4  ;;  %v736_v7 = vsel %vm731_vm3, %v733_v4, %v735_v6 }
  0x26   : > { %2980 = vmatpush3.msra.mxu0 %v294_v13  ;;  %2996 = vmatprep.mubr.msk.f32.mxu1 %vm3421_vm0, %v3420_v1 }
  0x27   : > { %2929 = vmatmul.mubr.msk.f32.gmra.mxu0 %vm357_vm2, %v328_v20  ;;  %3032 = vmatprep.subr.mxu0 %v3420_v1 }
  0x28   : > { %2931 = vmatprep.mubr.msk.f32.mxu0 %vm3421_vm0, %v3420_v1 }
  0x29   : > { %2997 = vmatmul.mubr.msk.f32.gmra.mxu1 %vm357_vm2, %v281_v22 }
  0x2a   : > { %2999 = vmatprep.mubr.msk.f32.mxu1 %vm3421_vm0, %v3420_v1 }
  0x2b   : > { %2932 = vmatmul.mubr.msk.f32.gmra.mxu0 %vm357_vm2, %v330_v23 }
  0x2c   : > { %2934 = vmatprep.mubr.msk.f32.mxu0 %vm3421_vm0, %v3420_v1 }
  0x2d   : > { %3000 = vmatmul.mubr.msk.f32.gmra.mxu1 %vm357_vm2, %v282_v25 }
  0x2e   : > { %3002 = vmatprep.mubr.msk.f32.mxu1 %vm3421_vm0, %v3420_v1 }
  0x2f   : > { %2935 = vmatmul.mubr.msk.f32.gmra.mxu0 %vm357_vm2, %v332_v26 }
  0x30   : > { %2937 = vmatprep.mubr.msk.f32.mxu0 %vm3421_vm0, %v3420_v1 }
  0x31   : > { %3003 = vmatmul.mubr.msk.f32.gmra.mxu1 %vm357_vm2, %v283_v28 }
  0x32   : > { %3005 = vmatprep.mubr.msk.f32.mxu1 %vm3421_vm0, %v3420_v1 }
  0x33   : > { %2938 = vmatmul.mubr.msk.f32.gmra.mxu0 %vm357_vm2, %v334_v29 }
  0x34   : > { %2940 = vmatprep.mubr.msk.f32.mxu0 %vm3421_vm0, %v3420_v1 }
  0x35   : > { %3006 = vmatmul.mubr.msk.f32.gmra.mxu1 %vm357_vm2, %v284_v31 }
  0x36   : > { %3008 = vmatprep.mubr.msk.f32.mxu1 %vm3421_vm0, %v3420_v1 }
  0x37   : > { %2941 = vmatmul.mubr.msk.f32.gmra.mxu0 %vm357_vm2, %v336_v32 }
  0x38   : > { %2943 = vmatprep.mubr.msk.f32.mxu0 %vm3421_vm0, %v3420_v1 }
  0x39   : > { %3009 = vmatmul.mubr.msk.f32.gmra.mxu1 %vm357_vm2, %v285_v34 }
  0x3a   : > { %3011 = vmatprep.mubr.msk.f32.mxu1 %vm3421_vm0, %v3420_v1 }
  0x3b   : > { %2944 = vmatmul.mubr.msk.f32.gmra.mxu0 %vm357_vm2, %v338_v35 }
  0x3c   : > { %2946 = vmatprep.mubr.msk.f32.mxu0 %vm3421_vm0, %v3420_v1 }
  0x3d   : > { %3012 = vmatmul.mubr.msk.f32.gmra.mxu1 %vm357_vm2, %v286_v37 }
  0x3e   : > { %3014 = vmatprep.mubr.msk.f32.mxu1 %vm3421_vm0, %v3420_v1 }
  0x3f   : > { %2947 = vmatmul.mubr.msk.f32.gmra.mxu0 %vm357_vm2, %v340_v38 }
  0x40   : > { %2949 = vmatprep.mubr.msk.f32.mxu0 %vm3421_vm0, %v3420_v1 }
  0x41   : > { %3015 = vmatmul.mubr.msk.f32.gmra.mxu1 %vm357_vm2, %v287_v40 }
  0x42   : > { %3017 = vmatprep.mubr.msk.f32.mxu1 %vm3421_vm0, %v3420_v1 }
  0x43   : > { %2950 = vmatmul.mubr.msk.f32.gmra.mxu0 %vm357_vm2, %v342_v41 }
  0x44   : > { %2952 = vmatprep.mubr.msk.f32.mxu0 %vm3421_vm0, %v3420_v1 }
  0x45   : > { %3018 = vmatmul.mubr.msk.f32.gmra.mxu1 %vm357_vm2, %v288_v43 }
  0x46   : > { %3020 = vmatprep.mubr.msk.f32.mxu1 %vm3421_vm0, %v3420_v1 }
  0x47   : > { %2953 = vmatmul.mubr.msk.f32.gmra.mxu0 %vm357_vm2, %v344_v44 }
  0x48   : > { %2955 = vmatprep.mubr.msk.f32.mxu0 %vm3421_vm0, %v3420_v1 }
  0x49   : > { %3021 = vmatmul.mubr.msk.f32.gmra.mxu1 %vm357_vm2, %v289_v46 }
  0x4a   : > { %3023 = vmatprep.mubr.msk.f32.mxu1 %vm3421_vm0, %v3420_v1 }
  0x4b   : > { %2956 = vmatmul.mubr.msk.f32.gmra.mxu0 %vm357_vm2, %v346_v47 }
  0x4c   : > { %2958 = vmatprep.mubr.msk.f32.mxu0 %vm3421_vm0, %v3420_v1 }
  0x4d   : > { %3024 = vmatmul.mubr.msk.f32.gmra.mxu1 %vm357_vm2, %v290_v49 }
  0x4e   : > { %3026 = vmatprep.mubr.msk.f32.mxu1 %vm3421_vm0, %v3420_v1 }
  0x4f   : > { %2959 = vmatmul.mubr.msk.f32.gmra.mxu0 %vm357_vm2, %v348_v50 }
  0x50   : > { %2961 = vmatprep.mubr.msk.f32.mxu0 %vm3421_vm0, %v3420_v1 }
  0x51   : > { %3027 = vmatmul.mubr.msk.f32.gmra.mxu1 %vm357_vm2, %v291_v52 }
  0x52   : > { %3029 = vmatprep.mubr.msk.f32.mxu1 %vm3421_vm0, %v3420_v1 }
  0x53   : > { %2962 = vmatmul.mubr.msk.f32.gmra.mxu0 %vm357_vm2, %v350_v53 }
  0x54   : > { %2964 = vmatprep.mubr.msk.f32.mxu0 %vm3421_vm0, %v3420_v1 }
  0x55   : > { %3030 = vmatmul.mubr.msk.f32.gmra.mxu1 %vm357_vm2, %v292_v55 }
  0x57   : > { %2965 = vmatmul.mubr.msk.f32.gmra.mxu0 %vm357_vm2, %v352_v56 }
  0x58   : > { %2967 = vmatprep.mubr.msk.f32.mxu0 %vm3421_vm0, %v3420_v1 }
  0x5b   : > { %2968 = vmatmul.mubr.msk.f32.gmra.mxu0 %vm357_vm2, %v354_v59 }
  0x5c   : > { %2970 = vmatprep.mubr.msk.f32.mxu0 %vm3421_vm0, %v3420_v1 }
  0x5f   : > { %2971 = vmatmul.mubr.msk.f32.gmra.mxu0 %vm357_vm2, %v356_v61 }
  0x60   : > { %2981 = vmatprep.mubr.msk.f32.mxu0 %vm3421_vm0, %v3420_v1 }
  0x63   : > { %2982 = vmatmul.mubr.msk.f32.vlgmr.msra.gmra.mxu0 %vm357_vm2, %v3550_v8  ;;  %v737_v8 = vrot.slane %v3567_v15, 2  ;;  %v3329_v15 = vld [vmem:[%s3542_s8 + $0x28] sm:$0xff] }
  0x64   : > { %2984 = vmatprep.mubr.msk.f32.mxu0 %vm3421_vm0, %v3420_v1  ;;  %3033 = vmatpush3.msra.mxu0 %v2687_v62 }
  0x65   : > { %3034 = vmatprep.subr.mxu0 %v3420_v1 }
  0x66   : > { %3035 = vmatpush3.msra.mxu0 %v2686_v63 }
  0x67   : > { %2985 = vmatmul.mubr.msk.f32.gmra.mxu0 %vm357_vm2, %v3553_v9  ;;  %3036 = vmatprep.subr.mxu0 %v3420_v1  ;;  %v738_v9 = vsel %vm731_vm3, %v735_v6, %v737_v8 }
  0x68   : > { %2987 = vmatprep.mubr.msk.f32.mxu0 %vm3421_vm0, %v3420_v1  ;;  %3037 = vmatpush3.msra.mxu0 %v2685_v0 }
  0x69   : > { %3038 = vmatprep.subr.mxu0 %v3420_v1 }
  0x6a   : > { %3039 = vmatpush3.msra.mxu0 %v2684_v2 }
  0x6b   : > { %2988 = vmatmul.mubr.msk.f32.gmra.mxu0 %vm357_vm2, %v3556_v10  ;;  %3187 = vmatprep.subr.mxu0 %v3420_v1  ;;  %v2711_v10 = vld [vmem:[%s4348_s2 + $0x38] sm:$0xff] }
  0x6c   : > { %3040 = vmatprep.mubr.msk.f32.mxu0 %vm3421_vm0, %v3420_v1  ;;  %3091 = vmatprep.subr.mxu1 %v2711_v10 }
  0x6d   : > { %3092 = vmatpush3.msra.mxu1 %v2711_v10 }
  0x6f   : > { %3041 = vmatmul.mubr.msk.f32.vlgmr.msra.gmra.mxu0 %vm357_vm2, %v734_v5 }
  0x70   : > { %3043 = vmatprep.mubr.msk.f32.mxu0 %vm3421_vm0, %v3420_v1 }
  0x73   : > { %3044 = vmatmul.mubr.msk.f32.gmra.mxu0 %vm357_vm2, %v736_v7 }
  0x74   : > { %3046 = vmatprep.mubr.msk.f32.mxu0 %vm3421_vm0, %v3420_v1 }
  0x77   : > { %3047 = vmatmul.mubr.msk.f32.gmra.mxu0 %vm357_vm2, %v738_v9 }
  0x78   : > { %3049 = vmatprep.mubr.msk.f32.mxu0 %vm3421_vm0, %v3420_v1 }
  0xde   : > { %v3748_v11 = vpop.f32.mrf.mxu0 }
  0xdf   : > { %v657_v12 = vpop.f32.mrf.mxu1 }
  0xe0   : > { %v2924_v13 = vpop.f32.mrf.mxu0 }
  0xe1   : > { %v2992_v14 = vpop.f32.mrf.mxu1 }
  0xe3   : > { %v3750_v16 = vpop.f32.mrf.mxu0 }
  0xe5   : > { %v2927_v17 = vpop.f32.mrf.mxu0  ;;  %v662_v18 = vpop.f32.mrf.mxu1 }
  0xe7   : > { %v3752_v19 = vpop.f32.mrf.mxu0  ;;  %v2995_v20 = vpop.f32.mrf.mxu1 }
  0xe9   : > { %v2930_v21 = vpop.f32.mrf.mxu0  ;;  %v667_v22 = vpop.f32.mrf.mxu1 }
  0xeb   : > { %v473_v23 = vpop.f32.mrf.mxu0  ;;  %v2998_v24 = vpop.f32.mrf.mxu1 }
  0xec   : > { %v2705_v24 = vld [vmem:[%s4349_s3] ss:$0 sm:$0xff] }
  0xed   : > { %v2933_v25 = vpop.f32.mrf.mxu0  ;;  %v672_v26 = vpop.f32.mrf.mxu1 }
  0xef   : > { %v478_v27 = vpop.f32.mrf.mxu0  ;;  %v3001_v28 = vpop.f32.mrf.mxu1 }
  0xf1   : > { %v2936_v29 = vpop.f32.mrf.mxu0  ;;  %v677_v30 = vpop.f32.mrf.mxu1 }
  0xf3   : > { %v483_v31 = vpop.f32.mrf.mxu0  ;;  %v3004_v32 = vpop.f32.mrf.mxu1 }
  0xf5   : > { %v2939_v33 = vpop.f32.mrf.mxu0  ;;  %v682_v34 = vpop.f32.mrf.mxu1 }
  0xf7   : > { %v488_v35 = vpop.f32.mrf.mxu0  ;;  %v3007_v36 = vpop.f32.mrf.mxu1 }
  0xf9   : > { %v2942_v37 = vpop.f32.mrf.mxu0  ;;  %v687_v38 = vpop.f32.mrf.mxu1 }
  0xfb   : > { %v493_v39 = vpop.f32.mrf.mxu0  ;;  %v3010_v40 = vpop.f32.mrf.mxu1 }
  0xfd   : > { %v2945_v41 = vpop.f32.mrf.mxu0  ;;  %v692_v42 = vpop.f32.mrf.mxu1 }
  0xff   : > { %v498_v43 = vpop.f32.mrf.mxu0  ;;  %v3013_v44 = vpop.f32.mrf.mxu1 }
 0x101   : > { %v2948_v45 = vpop.f32.mrf.mxu0  ;;  %v697_v46 = vpop.f32.mrf.mxu1 }
 0x103   : > { %v503_v47 = vpop.f32.mrf.mxu0  ;;  %v3016_v48 = vpop.f32.mrf.mxu1 }
 0x104   : > { %v2710_v47 = vld [vmem:[%s4348_s2 + $0x30] sm:$0xff]  ;;  %v2709_v48 = vld [vmem:[%s4348_s2 + $0x28] sm:$0xff] }
 0x105   : > { %v2951_v49 = vpop.f32.mrf.mxu0  ;;  %v702_v50 = vpop.f32.mrf.mxu1  ;;  %3093 = vmatprep.subr.mxu1 %v2710_v47 }
 0x106   : > { %3094 = vmatpush3.msra.mxu1 %v2710_v47  ;;  %v2708_v49 = vld [vmem:[%s4348_s2 + $0x20] sm:$0xff]  ;;  %v3793_v50 = vld [vmem:[%s4348_s2 + $0x18] sm:$0xff] }
 0x107   : > { %v508_v51 = vpop.f32.mrf.mxu0  ;;  %v3019_v52 = vpop.f32.mrf.mxu1  ;;  %3095 = vmatprep.subr.mxu1 %v2709_v48 }
 0x108   : > { %3096 = vmatpush3.msra.mxu1 %v2709_v48  ;;  %v1447_v48 = vld [vmem:[%s4348_s2 + $0x8] sm:$0xff] }
 0x109   : > { %v2954_v53 = vpop.f32.mrf.mxu0  ;;  %v707_v54 = vpop.f32.mrf.mxu1  ;;  %3097 = vmatprep.subr.mxu1 %v2708_v49 }
 0x10a   : > { %3098 = vmatpush3.msra.mxu1 %v2708_v49  ;;  %v1446_v49 = vld [vmem:[%s4348_s2] sm:$0xff] }
 0x10b   : > { %v513_v55 = vpop.f32.mrf.mxu0  ;;  %v3022_v56 = vpop.f32.mrf.mxu1  ;;  %3123 = vmatprep.subr.mxu1 %v3793_v50 }
 0x10d   : > { %v2957_v57 = vpop.f32.mrf.mxu0  ;;  %v712_v58 = vpop.f32.mrf.mxu1 }
 0x10f   : > { %v518_v59 = vpop.f32.mrf.mxu0  ;;  %v3025_v60 = vpop.f32.mrf.mxu1 }
 0x111   : > { %v2960_v61 = vpop.f32.mrf.mxu0  ;;  %v717_v62 = vpop.f32.mrf.mxu1 }
 0x113   : > { %v523_v63 = vpop.f32.mrf.mxu0  ;;  %v3028_v0 = vpop.f32.mrf.mxu1 }
 0x115   : > { %v2963_v2 = vpop.f32.mrf.mxu0  ;;  %v722_v3 = vpop.f32.mrf.mxu1 }
 0x117   : > { %v528_v4 = vpop.f32.mrf.mxu0  ;;  %v3031_v5 = vpop.f32.mrf.mxu1 }
 0x119   : > { %v2966_v6 = vpop.f32.mrf.mxu0 }
 0x11b   : > { %v533_v7 = vpop.f32.mrf.mxu0 }
 0x11d   : > { %v2969_v9 = vpop.f32.mrf.mxu0 }
 0x11e   : > { %v1307_v9 = vlaneseq }
 0x11f   : > { %v538_v10 = vpop.f32.mrf.mxu0 }
 0x121   : > { %v2972_v12 = vpop.f32.mrf.mxu0 }
 0x122   : > { %v1308_v12 = vshrl.u32 %v1307_v9, 7 }
 0x123   : > { %v642_v13 = vpop.f32.mrf.mxu0 }
 0x124   : > { %v643_v22 = vadd.f32 %v642_v13, %v3748_v11 }
 0x125   : > { %v2983_v14 = vpop.f32.mrf.mxu0 }
 0x127   : > { %v647_v17 = vpop.f32.mrf.mxu0 }
 0x128   : > { %v648_v27 = vadd.f32 %v647_v17, %v3750_v16  ;;  %v2706_v17 = vld [vmem:[%s4349_s3 + $0x1] ss:$0 sm:$0xff] }
 0x129   : > { %v2986_v18 = vpop.f32.mrf.mxu0 }
 0x12b   : > { %v652_v20 = vpop.f32.mrf.mxu0 }
 0x12c   : > { %v653_v33 = vadd.f32 %v652_v20, %v3752_v19  ;;  %v2707_v20 = vld [vmem:[%s4349_s3 + $0x2] ss:$0 sm:$0xff] }
 0x12d   : > { %v2989_v21 = vpop.f32.mrf.mxu0 }
 0x12e   : > { %v1327_v21 = vadd.s32 4294967295, %v1308_v12 }
 0x12f   : > { %v867_v23 = vpop.f32.mrf.mxu0 }
 0x130   : > { %v951_v25 = vadd.f32 %v867_v23, %v643_v22  ;;  %vm1344_vm4 = vcmp.ge.s32.totalorder %v1327_v21, 0 }
 0x131   : > { %v3042_v26 = vpop.f32.mrf.mxu0 }
 0x132   : > { %v973_v28 = vadd.f32 %v2705_v24, %v951_v25  ;;  %v1310_v26 = vadd.s32 16, %v1308_v12 }
 0x133   : > { %v872_v29 = vpop.f32.mrf.mxu0 }
 0x134   : > { %v3759_v30 = vmax.f32 %v973_v28, 0.0  ;;  %v952_v31 = vadd.f32 %v872_v29, %v648_v27 }
 0x135   : > { %v3045_v32 = vpop.f32.mrf.mxu0 }
 0x136   : > { %v974_v34 = vadd.f32 %v2705_v24, %v952_v31  ;;  %v1007_v11 = vsel %vm357_vm2, %v3759_v30, 0.0  ;;  %v1076_v35 = vmul.f32 %v3759_v30, %v3759_v30  ;;  %v1329_v32 = vadd.s32 4294967295, %v1310_v26 }
 0x137   : > { %1008 = vadd.xlane.f32.xlu0 %v1007_v11  ;;  %v877_v36 = vpop.f32.mrf.mxu0 }
 0x138   : > { %v3766_v37 = vmax.f32 %v974_v34, 0.0  ;;  %v953_v16 = vadd.f32 %v877_v36, %v653_v33  ;;  %v1093_v38 = vsel %vm357_vm2, %v1076_v35, 0.0  ;;  %vm1363_vm5 = vcmp.lt.s32.totalorder %v1329_v32, 16 }
 0x139   : > { %1094 = vadd.xlane.f32.xlu1 %v1093_v38  ;;  %v3048_v39 = vpop.f32.mrf.mxu0 }
 0x13a   : > { %v975_v40 = vadd.f32 %v2705_v24, %v953_v16  ;;  %v1010_v19 = vsel %vm357_vm2, %v3766_v37, 0.0  ;;  %v1077_v41 = vmul.f32 %v3766_v37, %v3766_v37 }
 0x13b   : > { %1011 = vadd.xlane.f32.xlu0 %v1010_v19  ;;  %v1477_v19 = vrot.slane %v3420_v1, 1 }
 0x13c   : > { %v3773_v42 = vmax.f32 %v975_v40, 0.0  ;;  %v1096_v43 = vsel %vm357_vm2, %v1077_v41, 0.0 }
 0x13e   : > { %v1013_v44 = vsel %vm357_vm2, %v3773_v42, 0.0  ;;  %v1078_v45 = vmul.f32 %v3773_v42, %v3773_v42 }
 0x13f   : > { %1097 = vadd.xlane.f32.xlu0 %v1096_v43  ;;  %1014 = vadd.xlane.f32.xlu1 %v1013_v44 }
 0x140   : > { %v1099_v46 = vsel %vm357_vm2, %v1078_v45, 0.0 }
 0x143   : > { %1100 = vadd.xlane.f32.xlu1 %v1099_v46  ;;  %v1448_v46 = vld [vmem:[%s4348_s2 + $0x10] sm:$0xff] }
 0x1c0   : > { %v1009_v51 = vpop.xlane.xlu0 %1008 }
 0x1c1   : > { %v1059_v52 = vmul.f32 0.03125, %v1009_v51  ;;  %v2733_v51 = vld [vmem:[%s4348_s2 + $0x50] sm:$0xff] }
 0x1c2   : > { %v1095_v53 = vpop.xlane.xlu1 %1094 }
 0x1c3   : > { %v1178_v54 = vmul.f32 %v1059_v52, %v1059_v52  ;;  %v1144_v55 = vmul.f32 0.03125, %v1095_v53  ;;  %v1161_v13 = vsub.f32 %v3759_v30, %v1059_v52  ;;  %v2732_v52 = vld [vmem:[%s4348_s2 + $0x48] sm:$0xff]  ;;  %v2731_v53 = vld [vmem:[%s4348_s2 + $0x40] sm:$0xff] }
 0x1c4   : > { %v1012_v56 = vpop.xlane.xlu0 %1011 }
 0x1c5   : > { %v1195_v57 = vsub.f32 %v1144_v55, %v1178_v54  ;;  %v1060_v58 = vmul.f32 0.03125, %v1012_v56  ;;  %v1869_v54 = vrot.slane %v3420_v1, 2 }
 0x1c7   : > { %v1212_v59 = vadd.f32 1e-05, %v1195_v57  ;;  %v1179_v62 = vmul.f32 %v1060_v58, %v1060_v58  ;;  %v1162_v23 = vsub.f32 %v3766_v37, %v1060_v58 }
 0x1c8   : > { %v1098_v60 = vpop.xlane.xlu0 %1097  ;;  %v1015_v61 = vpop.xlane.xlu1 %1014 }
 0x1c9   : > { %3290 = vrsqrt.f32 %v1212_v59  ;;  %v1145_v63 = vmul.f32 0.03125, %v1098_v60  ;;  %v1061_v0 = vmul.f32 0.03125, %v1015_v61 }
 0x1cb   : > { %v1196_v2 = vsub.f32 %v1145_v63, %v1179_v62  ;;  %v1180_v5 = vmul.f32 %v1061_v0, %v1061_v0  ;;  %v1163_v28 = vsub.f32 %v3773_v42, %v1061_v0 }
 0x1cc   : > { %v1101_v3 = vpop.xlane.xlu1 %1100 }
 0x1cd   : > { %v1213_v4 = vadd.f32 1e-05, %v1196_v2  ;;  %v1146_v6 = vmul.f32 0.03125, %v1101_v3 }
 0x1cf   : > { %3292 = vrsqrt.f32 %v1213_v4  ;;  %v1197_v7 = vsub.f32 %v1146_v6, %v1180_v5 }
 0x1d1   : > { %v1214_v10 = vadd.f32 1e-05, %v1197_v7 }
 0x1d3   : > { %3294 = vrsqrt.f32 %v1214_v10 }
 0x1d6   : > { %v3291_v14 = vpop.eup %3290 }
 0x1d7   : > { %v1246_v18 = vmul.f32 %v3291_v14, %v1161_v13 }
 0x1d9   : > { %v1268_v22 = vmul.f32 %v2706_v17, %v1246_v18 }
 0x1db   : > { %v1290_v24 = vadd.f32 %v2707_v20, %v1268_v22 }
 0x1dc   : > { %v3293_v25 = vpop.eup %3292 }
 0x1dd   : > { %v1247_v27 = vmul.f32 %v3293_v25, %v1162_v23  ;;  %v1429_v30 = vsel %vm1344_vm4, %v1290_v24, 0.0 }
 0x1de   : > { %v1472_v11 = vrot.slane %v1429_v30, 1  ;;  %v1864_v16 = vrot.slane %v1429_v30, 2 }
 0x1df   : > { %v1269_v29 = vmul.f32 %v2706_v17, %v1247_v27 }
 0x1e0   : > { %v3295_v31 = vpop.eup %3294 }
 0x1e1   : > { %v1248_v33 = vmul.f32 %v3295_v31, %v1163_v28  ;;  %v1291_v34 = vadd.f32 %v2707_v20, %v1269_v29 }
 0x1e3   : > { %v1270_v35 = vmul.f32 %v2706_v17, %v1248_v33  ;;  %v1473_v36 = vrot.slane %v1291_v34, 1  ;;  %v1865_v38 = vrot.slane %v1291_v34, 2 }
 0x1e5   : > { %v1292_v37 = vadd.f32 %v2707_v20, %v1270_v35  ;;  %v1474_v39 = vsel %vm321_vm1, %v1472_v11, %v1473_v36  ;;  %v3807_v40 = vsel %vm731_vm3, %v1864_v16, %v1865_v38 }
 0x1e6   : > { %3099 = vmatprep.mubr.msk.f32.mxu1 %vm357_vm2, %v1474_v39 }
 0x1e7   : > { %v3811_v41 = vsel %vm1363_vm5, %v1292_v37, 0.0 }
 0x1e8   : > { %v1475_v42 = vrot.slane %v3811_v41, 1  ;;  %v1867_v43 = vrot.slane %v3811_v41, 2 }
 0x1ea   : > { %v1476_v44 = vsel %vm321_vm1, %v1473_v36, %v1475_v42  ;;  %v1478_v45 = vsel %vm321_vm1, %v1475_v42, %v1477_v19  ;;  %v1868_v47 = vsel %vm731_vm3, %v1865_v38, %v1867_v43  ;;  %v1870_v55 = vsel %vm731_vm3, %v1867_v43, %v1869_v54 }
 0x1eb   : > { %3100 = vmatmul.mubr.msk.f32.vlgmr.msra.gmra.mxu1 %vm357_vm2, %v1476_v44 }
 0x1ec   : > { %3102 = vmatprep.mubr.msk.f32.mxu1 %vm357_vm2, %v1478_v45  ;;  %3124 = vmatpush3.msra.mxu1 %v3793_v50  ;;  %v2734_v50 = vld [vmem:[%s4348_s2 + $0x58] sm:$0xff] }
 0x1ed   : > { %3125 = vmatprep.subr.mxu1 %v1448_v46 }
 0x1ee   : > { %3126 = vmatpush3.msra.mxu1 %v1448_v46 }
 0x1ef   : > { %3103 = vmatmul.mubr.msk.f32.gmra.mxu1 %vm357_vm2, %v1477_v19  ;;  %3127 = vmatprep.subr.mxu1 %v1447_v48 }
 0x1f0   : > { %3105 = vmatprep.mubr.msk.f32.mxu1 %vm357_vm2, %v1477_v19  ;;  %3128 = vmatpush3.msra.mxu1 %v1447_v48 }
 0x1f1   : > { %3129 = vmatprep.subr.mxu1 %v1446_v49 }
 0x1f2   : > { %3130 = vmatpush3.msra.mxu1 %v1446_v49 }
 0x1f3   : > { %3106 = vmatmul.mubr.msk.f32.gmra.mxu1 %vm357_vm2, %v1477_v19  ;;  %3155 = vmatprep.subr.mxu1 %v2734_v50 }
 0x1f4   : > { %3108 = vmatprep.mubr.msk.f32.mxu1 %vm357_vm2, %v1477_v19 }
 0x1f7   : > { %3109 = vmatmul.mubr.msk.f32.gmra.mxu1 %vm357_vm2, %v1477_v19 }
 0x1f8   : > { %3111 = vmatprep.mubr.msk.f32.mxu1 %vm357_vm2, %v1477_v19 }
 0x1fb   : > { %3112 = vmatmul.mubr.msk.f32.gmra.mxu1 %vm357_vm2, %v1477_v19 }
 0x1fc   : > { %3114 = vmatprep.mubr.msk.f32.mxu1 %vm357_vm2, %v1477_v19 }
 0x1ff   : > { %3115 = vmatmul.mubr.msk.f32.gmra.mxu1 %vm357_vm2, %v1477_v19 }
 0x200   : > { %3117 = vmatprep.mubr.msk.f32.mxu1 %vm357_vm2, %v1477_v19 }
 0x203   : > { %3118 = vmatmul.mubr.msk.f32.gmra.mxu1 %vm357_vm2, %v1477_v19 }
 0x204   : > { %3120 = vmatprep.mubr.msk.f32.mxu1 %vm357_vm2, %v1477_v19 }
 0x207   : > { %3121 = vmatmul.mubr.msk.f32.gmra.mxu1 %vm357_vm2, %v1477_v19 }
 0x208   : > { %3131 = vmatprep.mubr.msk.f32.mxu1 %vm357_vm2, %v1429_v30 }
 0x20b   : > { %3132 = vmatmul.mubr.msk.f32.vlgmr.msra.gmra.mxu1 %vm357_vm2, %v1291_v34 }
 0x20c   : > { %3134 = vmatprep.mubr.msk.f32.mxu1 %vm357_vm2, %v3811_v41  ;;  %3156 = vmatpush3.msra.mxu1 %v2734_v50 }
 0x20d   : > { %3157 = vmatprep.subr.mxu1 %v2733_v51 }
 0x20e   : > { %3158 = vmatpush3.msra.mxu1 %v2733_v51 }
 0x20f   : > { %3135 = vmatmul.mubr.f32.gmra.mxu1 %v3420_v1  ;;  %3159 = vmatprep.subr.mxu1 %v2732_v52 }
 0x210   : > { %3137 = vmatprep.mubr.f32.mxu1 %v3420_v1  ;;  %3160 = vmatpush3.msra.mxu1 %v2732_v52 }
 0x211   : > { %3161 = vmatprep.subr.mxu1 %v2731_v53 }
 0x212   : > { %3162 = vmatpush3.msra.mxu1 %v2731_v53 }
 0x213   : > { %3138 = vmatmul.mubr.f32.gmra.mxu1 %v3420_v1 }
 0x214   : > { %3140 = vmatprep.mubr.f32.mxu1 %v3420_v1 }
 0x217   : > { %3141 = vmatmul.mubr.f32.gmra.mxu1 %v3420_v1 }
 0x218   : > { %3143 = vmatprep.mubr.f32.mxu1 %v3420_v1 }
 0x21b   : > { %3144 = vmatmul.mubr.f32.gmra.mxu1 %v3420_v1 }
 0x21c   : > { %3146 = vmatprep.mubr.f32.mxu1 %v3420_v1 }
 0x21f   : > { %3147 = vmatmul.mubr.f32.gmra.mxu1 %v3420_v1 }
 0x220   : > { %3149 = vmatprep.mubr.f32.mxu1 %v3420_v1 }
 0x223   : > { %3150 = vmatmul.mubr.f32.gmra.mxu1 %v3420_v1 }
 0x224   : > { %3152 = vmatprep.mubr.f32.mxu1 %v3420_v1 }
 0x227   : > { %3153 = vmatmul.mubr.f32.gmra.mxu1 %v3420_v1 }
 0x228   : > { %3163 = vmatprep.mubr.msk.f32.mxu1 %vm357_vm2, %v3807_v40 }
 0x22b   : > { %3164 = vmatmul.mubr.msk.f32.vlgmr.msra.gmra.mxu1 %vm357_vm2, %v1868_v47 }
 0x22c   : > { %3166 = vmatprep.mubr.msk.f32.mxu1 %vm357_vm2, %v1870_v55 }
 0x22f   : > { %3167 = vmatmul.mubr.msk.f32.gmra.mxu1 %vm357_vm2, %v1869_v54 }
 0x230   : > { %3169 = vmatprep.mubr.msk.f32.mxu1 %vm357_vm2, %v1869_v54 }
 0x233   : > { %3170 = vmatmul.mubr.msk.f32.gmra.mxu1 %vm357_vm2, %v1869_v54 }
 0x234   : > { %3172 = vmatprep.mubr.msk.f32.mxu1 %vm357_vm2, %v1869_v54 }
 0x237   : > { %3173 = vmatmul.mubr.msk.f32.gmra.mxu1 %vm357_vm2, %v1869_v54 }
 0x238   : > { %3175 = vmatprep.mubr.msk.f32.mxu1 %vm357_vm2, %v1869_v54 }
 0x23b   : > { %3176 = vmatmul.mubr.msk.f32.gmra.mxu1 %vm357_vm2, %v1869_v54 }
 0x23c   : > { %3178 = vmatprep.mubr.msk.f32.mxu1 %vm357_vm2, %v1869_v54 }
 0x23f   : > { %3179 = vmatmul.mubr.msk.f32.gmra.mxu1 %vm357_vm2, %v1869_v54 }
 0x240   : > { %3181 = vmatprep.mubr.msk.f32.mxu1 %vm357_vm2, %v1869_v54 }
 0x243   : > { %3182 = vmatmul.mubr.msk.f32.gmra.mxu1 %vm357_vm2, %v1869_v54 }
 0x244   : > { %3184 = vmatprep.mubr.msk.f32.mxu1 %vm357_vm2, %v1869_v54 }
 0x247   : > { %3185 = vmatmul.mubr.msk.f32.gmra.mxu1 %vm357_vm2, %v1869_v54 }
 0x2ab   : > { %v3101_v56 = vpop.f32.mrf.mxu1 }
 0x2ad   : > { %v1603_v57 = vpop.f32.mrf.mxu1 }
 0x2af   : > { %v3104_v58 = vpop.f32.mrf.mxu1 }
 0x2b1   : > { %v1613_v59 = vpop.f32.mrf.mxu1 }
 0x2b3   : > { %v3107_v60 = vpop.f32.mrf.mxu1 }
 0x2b5   : > { %v1623_v61 = vpop.f32.mrf.mxu1 }
 0x2b7   : > { %v3110_v62 = vpop.f32.mrf.mxu1 }
 0x2b9   : > { %v1633_v63 = vpop.f32.mrf.mxu1 }
 0x2bb   : > { %v3113_v0 = vpop.f32.mrf.mxu1 }
 0x2bd   : > { %v1643_v2 = vpop.f32.mrf.mxu1 }
 0x2bf   : > { %v3891_v3 = vpop.f32.mrf.mxu1 }
 0x2c1   : > { %v3893_v4 = vpop.f32.mrf.mxu1 }
 0x2c3   : > { %v3119_v5 = vpop.f32.mrf.mxu1 }
 0x2c5   : > { %v1663_v6 = vpop.f32.mrf.mxu1 }
 0x2c7   : > { %v3122_v7 = vpop.f32.mrf.mxu1 }
 0x2c9   : > { %v1673_v9 = vpop.f32.mrf.mxu1 }
 0x2cb   : > { %v3133_v10 = vpop.f32.mrf.mxu1 }
 0x2cc   : > { %v1786_v12 = vadd.f32 %v3133_v10, %v3101_v56 }
 0x2cd   : > { %v1780_v13 = vpop.f32.mrf.mxu1 }
 0x2ce   : > { %v1781_v14 = vadd.f32 %v1780_v13, %v1603_v57 }
 0x2cf   : > { %v3136_v17 = vpop.f32.mrf.mxu1 }
 0x2d0   : > { %v1796_v18 = vadd.f32 %v3136_v17, %v3104_v58 }
 0x2d1   : > { %v1790_v20 = vpop.f32.mrf.mxu1 }
 0x2d2   : > { %v1791_v21 = vadd.f32 %v1790_v20, %v1613_v59 }
 0x2d3   : > { %v3139_v22 = vpop.f32.mrf.mxu1 }
 0x2d4   : > { %v3895_v23 = vadd.f32 %v3139_v22, %v3107_v60 }
 0x2d5   : > { %v1800_v24 = vpop.f32.mrf.mxu1 }
 0x2d6   : > { %v3897_v25 = vadd.f32 %v1800_v24, %v1623_v61  ;;  %v3924_v61 = vld [vmem:[%s4349_s3 + $0x3] ss:$0 sm:$0xff] }
 0x2d7   : > { %v3142_v26 = vpop.f32.mrf.mxu1 }
 0x2d8   : > { %v3899_v27 = vadd.f32 %v3142_v26, %v3110_v62 }
 0x2d9   : > { %v1810_v28 = vpop.f32.mrf.mxu1 }
 0x2da   : > { %v3901_v29 = vadd.f32 %v1810_v28, %v1633_v63 }
 0x2db   : > { %v3145_v30 = vpop.f32.mrf.mxu1 }
 0x2dc   : > { %v3903_v31 = vadd.f32 %v3145_v30, %v3113_v0 }
 0x2dd   : > { %v1820_v32 = vpop.f32.mrf.mxu1 }
 0x2de   : > { %v3905_v33 = vadd.f32 %v1820_v32, %v1643_v2 }
 0x2df   : > { %v3148_v34 = vpop.f32.mrf.mxu1 }
 0x2e1   : > { %v1830_v11 = vpop.f32.mrf.mxu1 }
 0x2e3   : > { %v3151_v35 = vpop.f32.mrf.mxu1 }
 0x2e4   : > { %v1846_v55 = vadd.f32 %v3151_v35, %v3119_v5 }
 0x2e5   : > { %v1840_v36 = vpop.f32.mrf.mxu1 }
 0x2e6   : > { %v1841_v63 = vadd.f32 %v1840_v36, %v1663_v6 }
 0x2e7   : > { %v3154_v16 = vpop.f32.mrf.mxu1 }
 0x2e8   : > { %v1856_v56 = vadd.f32 %v3154_v16, %v3122_v7  ;;  %v1836_v7 = vadd.f32 %v3148_v34, %v3891_v3  ;;  %v1831_v3 = vadd.f32 %v1830_v11, %v3893_v4 }
 0x2e9   : > { %v1850_v38 = vpop.f32.mrf.mxu1 }
 0x2ea   : > { %v1851_v58 = vadd.f32 %v1850_v38, %v1673_v9 }
 0x2eb   : > { %v3165_v37 = vpop.f32.mrf.mxu1 }
 0x2ec   : > { %v3907_v39 = vadd.f32 %v3165_v37, %v1786_v12 }
 0x2ed   : > { %v1995_v40 = vpop.f32.mrf.mxu1 }
 0x2ee   : > { %v3909_v19 = vadd.f32 %v1995_v40, %v1781_v14 }
 0x2ef   : > { %v3168_v41 = vpop.f32.mrf.mxu1 }
 0x2f0   : > { %v3911_v42 = vadd.f32 %v3168_v41, %v1796_v18 }
 0x2f1   : > { %v2005_v43 = vpop.f32.mrf.mxu1 }
 0x2f2   : > { %v3913_v44 = vadd.f32 %v2005_v43, %v1791_v21 }
 0x2f3   : > { %v3915_v45 = vpop.f32.mrf.mxu1 }
 0x2f5   : > { %v3917_v46 = vpop.f32.mrf.mxu1 }
 0x2f7   : > { %v3174_v47 = vpop.f32.mrf.mxu1 }
 0x2f9   : > { %v3919_v48 = vpop.f32.mrf.mxu1 }
 0x2fb   : > { %v3177_v49 = vpop.f32.mrf.mxu1 }
 0x2fc   : > { %v2083_v4 = vadd.f32 %v3177_v49, %v3903_v31 }
 0x2fd   : > { %v2035_v50 = vpop.f32.mrf.mxu1 }
 0x2fe   : > { %v2104_v40 = vadd.f32 %v3924_v61, %v2083_v4  ;;  %v2082_v41 = vadd.f32 %v2035_v50, %v3905_v33 }
 0x2ff   : > { %v3180_v51 = vpop.f32.mrf.mxu1 }
 0x300   : > { %v2085_v17 = vadd.f32 %v3180_v51, %v1836_v7 }
 0x301   : > { %v2045_v52 = vpop.f32.mrf.mxu1 }
 0x302   : > { %v2106_v26 = vadd.f32 %v3924_v61, %v2085_v17  ;;  %v2084_v28 = vadd.f32 %v2045_v52, %v1831_v3  ;;  %v2081_v52 = vadd.f32 %v3174_v47, %v3899_v27  ;;  %v2080_v27 = vadd.f32 %v3919_v48, %v3901_v29 }
 0x303   : > { %v3183_v53 = vpop.f32.mrf.mxu1  ;;  %v2098_v17 = vadd.f32 %v3924_v61, %v3911_v42 }
 0x304   : > { %v2087_v59 = vadd.f32 %v3183_v53, %v1846_v55  ;;  %v3956_v11 = vmax.f32 %v2106_v26, 0.0  ;;  %v2105_v36 = vadd.f32 %v3924_v61, %v2084_v28  ;;  %v3974_v53 = vmax.f32 %v2104_v40, 0.0 }
 0x305   : > { %v2055_v54 = vpop.f32.mrf.mxu1  ;;  %v2097_v26 = vadd.f32 %v3924_v61, %v3913_v44 }
 0x306   : > { %v2108_v10 = vadd.f32 %v3924_v61, %v2087_v59  ;;  %v2086_v12 = vadd.f32 %v2055_v54, %v1841_v63  ;;  %v3966_v31 = vmax.f32 %v2105_v36, 0.0  ;;  %v2202_v49 = vmul.f32 %v3956_v11, %v3956_v11 }
 0x307   : > { %v3186_v57 = vpop.f32.mrf.mxu1  ;;  %v2160_v51 = vsel %vm357_vm2, %v3956_v11, 0.0  ;;  %v2103_v54 = vadd.f32 %v3924_v61, %v2082_v41  ;;  %v2154_v59 = vsel %vm357_vm2, %v3974_v53, 0.0  ;;  %v2101_v63 = vadd.f32 %v3924_v61, %v2080_v27 }
 0x308   : > { %v2089_v60 = vadd.f32 %v3186_v57, %v1856_v56  ;;  %v3938_v18 = vmax.f32 %v2108_v10, 0.0  ;;  %v2107_v20 = vadd.f32 %v3924_v61, %v2086_v12  ;;  %v2240_v33 = vsel %vm357_vm2, %v2202_v49, 0.0 }
 0x309   : > { %v2065_v62 = vpop.f32.mrf.mxu1  ;;  %v2201_v50 = vmul.f32 %v3966_v31, %v3966_v31  ;;  %v2157_v55 = vsel %vm357_vm2, %v3966_v31, 0.0  ;;  %v2102_v56 = vadd.f32 %v3924_v61, %v2081_v52  ;;  %v3985_v47 = vmax.f32 %v2103_v54, 0.0 }
 0x30a   : > { %v2110_v0 = vadd.f32 %v3924_v61, %v2089_v60  ;;  %v2088_v2 = vadd.f32 %v2065_v62, %v1851_v58  ;;  %v3948_v30 = vmax.f32 %v2107_v20, 0.0  ;;  %v2204_v34 = vmul.f32 %v3938_v18, %v3938_v18 }
 0x30b   : > { %v2166_v35 = vsel %vm357_vm2, %v3938_v18, 0.0  ;;  %v2237_v57 = vsel %vm357_vm2, %v2201_v50, 0.0  ;;  %v2200_v58 = vmul.f32 %v3974_v53, %v3974_v53  ;;  %v2079_v60 = vadd.f32 %v3915_v45, %v3895_v23 }
 0x30c   : > { %v3928_v13 = vmax.f32 %v2110_v0, 0.0  ;;  %v2109_v5 = vadd.f32 %v3924_v61, %v2088_v2  ;;  %v2246_v16 = vsel %vm357_vm2, %v2204_v34, 0.0  ;;  %v2203_v38 = vmul.f32 %v3948_v30, %v3948_v30 }
 0x30d   : > { %v2163_v37 = vsel %vm357_vm2, %v3948_v30, 0.0  ;;  %v3994_v62 = vmax.f32 %v2102_v56, 0.0  ;;  %v2234_v29 = vsel %vm357_vm2, %v2200_v58, 0.0  ;;  %v2199_v48 = vmul.f32 %v3985_v47, %v3985_v47 }
 0x30e   : > { %v3932_v9 = vmax.f32 %v2109_v5, 0.0  ;;  %v2172_v14 = vsel %vm357_vm2, %v3928_v13, 0.0  ;;  %v2206_v6 = vmul.f32 %v3928_v13, %v3928_v13  ;;  %v2243_v43 = vsel %vm357_vm2, %v2203_v38, 0.0 }
 0x30f   : > { %2173 = vadd.xlane.f32.xlu0 %v2172_v14  ;;  %v2151_v0 = vsel %vm357_vm2, %v3985_v47, 0.0  ;;  %v2100_v2 = vadd.f32 %v3924_v61, %v2079_v60  ;;  %v2078_v23 = vadd.f32 %v3917_v46, %v3897_v25  ;;  %v4005_v45 = vmax.f32 %v2101_v63, 0.0  ;;  %v3332_v60 = vld [vmem:[%s3542_s8 + $0x40] sm:$0xff] }
 0x310   : > { %v2252_v21 = vsel %vm357_vm2, %v2206_v6, 0.0  ;;  %v2205_v22 = vmul.f32 %v3932_v9, %v3932_v9  ;;  %v2169_v24 = vsel %vm357_vm2, %v3932_v9, 0.0  ;;  %v2231_v10 = vsel %vm357_vm2, %v2199_v48, 0.0 }
 0x311   : > { %2253 = vadd.xlane.f32.xlu1 %v2252_v21  ;;  %v2198_v12 = vmul.f32 %v3994_v62, %v3994_v62  ;;  %v2148_v5 = vsel %vm357_vm2, %v3994_v62, 0.0  ;;  %v4012_v7 = vmax.f32 %v2100_v2, 0.0  ;;  %v2099_v14 = vadd.f32 %v3924_v61, %v2078_v23  ;;  %v3333_v2 = vld [vmem:[%s3542_s8 + $0x48] sm:$0xff] }
 0x312   : > { %v2249_v32 = vsel %vm357_vm2, %v2205_v22, 0.0  ;;  %v2197_v25 = vmul.f32 %v4005_v45, %v4005_v45  ;;  %v2145_v46 = vsel %vm357_vm2, %v4005_v45, 0.0  ;;  %v2096_v36 = vadd.f32 %v3924_v61, %v3907_v39 }
 0x313   : > { %2170 = vadd.xlane.f32.xlu0 %v2169_v24  ;;  %v2228_v6 = vsel %vm357_vm2, %v2198_v12, 0.0  ;;  %v4022_v20 = vmax.f32 %v2099_v14, 0.0  ;;  %v2196_v22 = vmul.f32 %v4012_v7, %v4012_v7  ;;  %v2142_v3 = vsel %vm357_vm2, %v4012_v7, 0.0  ;;  %v3334_v12 = vld [vmem:[%s3542_s8 + $0x50] sm:$0xff] }
 0x314   : > { %v2225_v21 = vsel %vm357_vm2, %v2197_v25, 0.0  ;;  %v4029_v24 = vmax.f32 %v2098_v17, 0.0  ;;  %v4045_v44 = vmax.f32 %v2097_v26, 0.0  ;;  %v4056_v40 = vmax.f32 %v2096_v36, 0.0  ;;  %v3336_v17 = vld [vmem:[%s3542_s8 + $0x60] sm:$0xff] }
 0x315   : > { %2250 = vadd.xlane.f32.xlu1 %v2249_v32  ;;  %v2222_v42 = vsel %vm357_vm2, %v2196_v22, 0.0  ;;  %v2195_v28 = vmul.f32 %v4022_v20, %v4022_v20  ;;  %v3328_v32 = vld [vmem:[%s3542_s8 + $0x20] sm:$0xff]  ;;  %v2095_v41 = vadd.f32 %v3924_v61, %v3909_v19  ;;  %v747_v63 = vrot.slane %v3332_v60, 2 }
 0x316   : > { %v739_v34 = vrot.slane %v3328_v32, 2  ;;  %v2194_v38 = vmul.f32 %v4029_v24, %v4029_v24  ;;  %v2193_v49 = vmul.f32 %v4045_v44, %v4045_v44  ;;  %v2133_v54 = vsel %vm357_vm2, %v4045_v44, 0.0 }
 0x317   : > { %2167 = vadd.xlane.f32.xlu0 %v2166_v35  ;;  %v2139_v35 = vsel %vm357_vm2, %v4022_v20, 0.0  ;;  %v4071_v19 = vmax.f32 %v2095_v41, 0.0  ;;  %v2192_v50 = vmul.f32 %v4056_v40, %v4056_v40  ;;  %v2130_v27 = vsel %vm357_vm2, %v4056_v40, 0.0  ;;  %v2410_v41 = vld [vmem:[%s4349_s3 + $0x7] sm:$0x1] }
 0x318   : > { %v740_v4 = vsel %vm731_vm3, %v737_v8, %v739_v34  ;;  %v2136_v8 = vsel %vm357_vm2, %v4029_v24, 0.0  ;;  %v2213_v61 = vsel %vm357_vm2, %v2193_v49, 0.0  ;;  %v749_v23 = vrot.slane %v3333_v2, 2 }
 0x319   : > { %2247 = vadd.xlane.f32.xlu1 %v2246_v16  ;;  %3050 = vmatmul.mubr.msk.f32.gmra.mxu0 %vm357_vm2, %v740_v4  ;;  %v2219_v16 = vsel %vm357_vm2, %v2195_v28, 0.0  ;;  %v2210_v58 = vsel %vm357_vm2, %v2192_v50, 0.0  ;;  %v3338_v28 = vld [vmem:[%s3542_s8 + $0x70] sm:$0xff] }
 0x31a   : > { %3052 = vmatprep.mubr.msk.f32.mxu0 %vm3421_vm0, %v3420_v1  ;;  %v759_v32 = vrot.slane %v3338_v28, 2 }
 0x31b   : > { %2164 = vadd.xlane.f32.xlu0 %v2163_v37  ;;  %v741_v37 = vrot.slane %v3329_v15, 2 }
 0x31d   : > { %2244 = vadd.xlane.f32.xlu1 %v2243_v43  ;;  %v742_v39 = vsel %vm731_vm3, %v739_v34, %v741_v37  ;;  %v2216_v43 = vsel %vm357_vm2, %v2194_v38, 0.0 }
 0x31e   : > { %3053 = vmatmul.mubr.msk.f32.gmra.mxu0 %vm357_vm2, %v742_v39 }
 0x31f   : > { %2161 = vadd.xlane.f32.xlu0 %v2160_v51  ;;  %3055 = vmatprep.mubr.msk.f32.mxu0 %vm3421_vm0, %v3420_v1  ;;  %v3330_v51 = vld [vmem:[%s3542_s8 + $0x30] sm:$0xff] }
 0x320   : > { %v743_v52 = vrot.slane %v3330_v51, 2 }
 0x321   : > { %2241 = vadd.xlane.f32.xlu1 %v2240_v33 }
 0x322   : > { %v744_v33 = vsel %vm731_vm3, %v741_v37, %v743_v52  ;;  %v3341_v37 = vld [vmem:[%s3542_s8 + $0x88] sm:$0xff] }
 0x323   : > { %2158 = vadd.xlane.f32.xlu0 %v2157_v55  ;;  %3056 = vmatmul.mubr.msk.f32.gmra.mxu0 %vm357_vm2, %v744_v33  ;;  %v3331_v55 = vld [vmem:[%s3542_s8 + $0x38] sm:$0xff] }
 0x324   : > { %3058 = vmatprep.mubr.msk.f32.mxu0 %vm3421_vm0, %v3420_v1  ;;  %v745_v56 = vrot.slane %v3331_v55, 2 }
 0x325   : > { %2238 = vadd.xlane.f32.xlu1 %v2237_v57 }
 0x326   : > { %v746_v57 = vsel %vm731_vm3, %v743_v52, %v745_v56  ;;  %v748_v48 = vsel %vm731_vm3, %v745_v56, %v747_v63 }
 0x327   : > { %2155 = vadd.xlane.f32.xlu0 %v2154_v59  ;;  %3059 = vmatmul.mubr.msk.f32.gmra.mxu0 %vm357_vm2, %v746_v57  ;;  %v2191_v59 = vmul.f32 %v4071_v19, %v4071_v19 }
 0x328   : > { %3061 = vmatprep.mubr.msk.f32.mxu0 %vm3421_vm0, %v3420_v1 }
 0x329   : > { %2235 = vadd.xlane.f32.xlu1 %v2234_v29  ;;  %v2127_v29 = vsel %vm357_vm2, %v4071_v19, 0.0 }
 0x32b   : > { %2152 = vadd.xlane.f32.xlu0 %v2151_v0  ;;  %3062 = vmatmul.mubr.msk.f32.gmra.mxu0 %vm357_vm2, %v748_v48  ;;  %v2207_v0 = vsel %vm357_vm2, %v2191_v59, 0.0 }
 0x32c   : > { %3064 = vmatprep.mubr.msk.f32.mxu0 %vm3421_vm0, %v3420_v1 }
 0x32d   : > { %2232 = vadd.xlane.f32.xlu1 %v2231_v10  ;;  %v750_v10 = vsel %vm731_vm3, %v747_v63, %v749_v23 }
 0x32f   : > { %2149 = vadd.xlane.f32.xlu0 %v2148_v5  ;;  %3065 = vmatmul.mubr.msk.f32.gmra.mxu0 %vm357_vm2, %v750_v10  ;;  %v751_v5 = vrot.slane %v3334_v12, 2 }
 0x330   : > { %3067 = vmatprep.mubr.msk.f32.mxu0 %vm3421_vm0, %v3420_v1 }
 0x331   : > { %2229 = vadd.xlane.f32.xlu1 %v2228_v6  ;;  %v752_v14 = vsel %vm731_vm3, %v749_v23, %v751_v5  ;;  %v3335_v6 = vld [vmem:[%s3542_s8 + $0x58] sm:$0xff] }
 0x332   : > { %v753_v25 = vrot.slane %v3335_v6, 2 }
 0x333   : > { %2146 = vadd.xlane.f32.xlu0 %v2145_v46  ;;  %3068 = vmatmul.mubr.msk.f32.gmra.mxu0 %vm357_vm2, %v752_v14 }
 0x334   : > { %3070 = vmatprep.mubr.msk.f32.mxu0 %vm3421_vm0, %v3420_v1  ;;  %v754_v46 = vsel %vm731_vm3, %v751_v5, %v753_v25 }
 0x335   : > { %2226 = vadd.xlane.f32.xlu1 %v2225_v21  ;;  %v755_v21 = vrot.slane %v3336_v17, 2 }
 0x337   : > { %2143 = vadd.xlane.f32.xlu0 %v2142_v3  ;;  %3071 = vmatmul.mubr.msk.f32.gmra.mxu0 %vm357_vm2, %v754_v46  ;;  %v756_v22 = vsel %vm731_vm3, %v753_v25, %v755_v21  ;;  %v3337_v3 = vld [vmem:[%s3542_s8 + $0x68] sm:$0xff] }
 0x338   : > { %3073 = vmatprep.mubr.msk.f32.mxu0 %vm3421_vm0, %v3420_v1  ;;  %v757_v26 = vrot.slane %v3337_v3, 2 }
 0x339   : > { %2223 = vadd.xlane.f32.xlu1 %v2222_v42 }
 0x33a   : > { %v758_v42 = vsel %vm731_vm3, %v755_v21, %v757_v26  ;;  %v760_v34 = vsel %vm731_vm3, %v757_v26, %v759_v32 }
 0x33b   : > { %2140 = vadd.xlane.f32.xlu0 %v2139_v35  ;;  %3074 = vmatmul.mubr.msk.f32.gmra.mxu0 %vm357_vm2, %v756_v22  ;;  %v3339_v35 = vld [vmem:[%s3542_s8 + $0x78] sm:$0xff] }
 0x33c   : > { %3076 = vmatprep.mubr.msk.f32.mxu0 %vm3421_vm0, %v3420_v1  ;;  %v761_v4 = vrot.slane %v3339_v35, 2 }
 0x33d   : > { %2220 = vadd.xlane.f32.xlu1 %v2219_v16  ;;  %v3340_v16 = vld [vmem:[%s3542_s8 + $0x80] sm:$0xff] }
 0x33e   : > { %v762_v36 = vsel %vm731_vm3, %v759_v32, %v761_v4  ;;  %v763_v38 = vrot.slane %v3340_v16, 2 }
 0x33f   : > { %2137 = vadd.xlane.f32.xlu0 %v2136_v8  ;;  %3077 = vmatmul.mubr.msk.f32.gmra.mxu0 %vm357_vm2, %v758_v42  ;;  %v765_v8 = vrot.slane %v3341_v37, 2  ;;  %v4164_v37 = vld [vmem:[%s4349_s3 + $0x4] ss:$0 sm:$0xff] }
 0x340   : > { %3079 = vmatprep.mubr.msk.f32.mxu0 %vm3421_vm0, %v3420_v1  ;;  %v764_v15 = vsel %vm731_vm3, %v761_v4, %v763_v38 }
 0x341   : > { %2217 = vadd.xlane.f32.xlu1 %v2216_v43  ;;  %v766_v39 = vsel %vm731_vm3, %v763_v38, %v765_v8  ;;  %v3422_v43 = vmov 0  }
 0x342   : > { %3289 = vset.pattern.permute.xlu0 %v3422_v43 }
 0x343   : > { %2134 = vadd.xlane.f32.xlu0 %v2133_v54  ;;  %3080 = vmatmul.mubr.msk.f32.gmra.mxu0 %vm357_vm2, %v760_v34 }
 0x344   : > { %3082 = vmatprep.mubr.msk.f32.mxu0 %vm3421_vm0, %v3420_v1 }
 0x345   : > { %2214 = vadd.xlane.f32.xlu1 %v2213_v61 }
 0x347   : > { %2131 = vadd.xlane.f32.xlu0 %v2130_v27  ;;  %3083 = vmatmul.mubr.msk.f32.gmra.mxu0 %vm357_vm2, %v762_v36 }
 0x348   : > { %3085 = vmatprep.mubr.msk.f32.mxu0 %vm3421_vm0, %v3420_v1 }
 0x349   : > { %2211 = vadd.xlane.f32.xlu1 %v2210_v58 }
 0x34b   : > { %2128 = vadd.xlane.f32.xlu0 %v2127_v29  ;;  %3086 = vmatmul.mubr.msk.f32.gmra.mxu0 %vm357_vm2, %v764_v15 }
 0x34c   : > { %3088 = vmatprep.mubr.msk.f32.mxu0 %vm3421_vm0, %v3420_v1 }
 0x34d   : > { %2208 = vadd.xlane.f32.xlu1 %v2207_v0 }
 0x34f   : > { %3089 = vmatmul.mubr.msk.f32.gmra.mxu0 %vm357_vm2, %v766_v39 }
 0x350   : > { %3219 = vmatprep.mubr.msk.f32.mxu0 %vm3421_vm0, %v3420_v1 }
 0x361   : > { %2413 = vperm.xlu0 %3289, %v2410_v41  }
 0x398   : > { %v2174_v49 = vpop.xlane.xlu0 %2173 }
 0x399   : > { %v2190_v51 = vmul.f32 0.03125, %v2174_v49 }
 0x39a   : > { %v2254_v52 = vpop.xlane.xlu1 %2253 }
 0x39b   : > { %v2302_v54 = vmul.f32 %v2190_v51, %v2190_v51  ;;  %v2270_v33 = vmul.f32 0.03125, %v2254_v52  ;;  %v2286_v4 = vsub.f32 %v3928_v13, %v2190_v51  ;;  %v4171_v13 = vld [vmem:[%s4349_s3 + $0x5] ss:$0 sm:$0xff] }
 0x39c   : > { %v2171_v61 = vpop.xlane.xlu0 %2170 }
 0x39d   : > { %v2318_v50 = vsub.f32 %v2270_v33, %v2302_v54  ;;  %v2189_v55 = vmul.f32 0.03125, %v2171_v61 }
 0x39e   : > { %v2251_v56 = vpop.xlane.xlu1 %2250 }
 0x39f   : > { %v2334_v27 = vadd.f32 1e-05, %v2318_v50  ;;  %v2301_v57 = vmul.f32 %v2189_v55, %v2189_v55  ;;  %v2269_v58 = vmul.f32 0.03125, %v2251_v56  ;;  %v2285_v51 = vsub.f32 %v3932_v9, %v2189_v55 }
 0x3a0   : > { %v2168_v59 = vpop.xlane.xlu0 %2167 }
 0x3a1   : > { %3296 = vrsqrt.f32 %v2334_v27  ;;  %v2317_v60 = vsub.f32 %v2269_v58, %v2301_v57  ;;  %v4144_v63 = vmul.f32 0.03125, %v2168_v59 }
 0x3a2   : > { %v2248_v29 = vpop.xlane.xlu1 %2247 }
 0x3a3   : > { %v2333_v48 = vadd.f32 1e-05, %v2317_v60  ;;  %v2300_v0 = vmul.f32 %v4144_v63, %v4144_v63  ;;  %v2268_v2 = vmul.f32 0.03125, %v2248_v29  ;;  %v2284_v9 = vsub.f32 %v3938_v18, %v4144_v63 }
 0x3a4   : > { %v2165_v23 = vpop.xlane.xlu0 %2164 }
 0x3a5   : > { %3298 = vrsqrt.f32 %v2333_v48  ;;  %v2316_v10 = vsub.f32 %v2268_v2, %v2300_v0  ;;  %v4148_v12 = vmul.f32 0.03125, %v2165_v23 }
 0x3a6   : > { %v2245_v5 = vpop.xlane.xlu1 %2244 }
 0x3a7   : > { %v2332_v14 = vadd.f32 1e-05, %v2316_v10  ;;  %v2299_v6 = vmul.f32 %v4148_v12, %v4148_v12  ;;  %v2267_v25 = vmul.f32 0.03125, %v2245_v5  ;;  %v2283_v63 = vsub.f32 %v3948_v30, %v4148_v12 }
 0x3a8   : > { %v2162_v46 = vpop.xlane.xlu0 %2161 }
 0x3a9   : > { %3300 = vrsqrt.f32 %v2332_v14  ;;  %v2315_v17 = vsub.f32 %v2267_v25, %v2299_v6  ;;  %v4152_v21 = vmul.f32 0.03125, %v2162_v46 }
 0x3aa   : > { %v2242_v22 = vpop.xlane.xlu1 %2241 }
 0x3ab   : > { %v2331_v3 = vadd.f32 1e-05, %v2315_v17  ;;  %v2298_v26 = vmul.f32 %v4152_v21, %v4152_v21  ;;  %v2266_v42 = vmul.f32 0.03125, %v2242_v22  ;;  %v2282_v12 = vsub.f32 %v3956_v11, %v4152_v21 }
 0x3ac   : > { %v2159_v28 = vpop.xlane.xlu0 %2158 }
 0x3ad   : > { %3302 = vrsqrt.f32 %v2331_v3  ;;  %v2314_v32 = vsub.f32 %v2266_v42, %v2298_v26  ;;  %v4156_v34 = vmul.f32 0.03125, %v2159_v28 }
 0x3ae   : > { %v3297_v35 = vpop.eup %3296  ;;  %v2239_v36 = vpop.xlane.xlu1 %2238 }
 0x3af   : > { %v2330_v16 = vadd.f32 1e-05, %v2314_v32  ;;  %v2297_v38 = vmul.f32 %v4156_v34, %v4156_v34  ;;  %v2265_v15 = vmul.f32 0.03125, %v2239_v36  ;;  %v2366_v39 = vmul.f32 %v3297_v35, %v2286_v4 }
 0x3b0   : > { %v2156_v8 = vpop.xlane.xlu0 %2155  ;;  %v2281_v21 = vsub.f32 %v3966_v31, %v4156_v34 }
 0x3b1   : > { %3304 = vrsqrt.f32 %v2330_v16  ;;  %v2313_v41 = vsub.f32 %v2265_v15, %v2297_v38  ;;  %v4166_v43 = vmul.f32 0.03125, %v2156_v8  ;;  %v2387_v54 = vmul.f32 %v4164_v37, %v2366_v39 }
 0x3b2   : > { %v3299_v49 = vpop.eup %3298  ;;  %v2236_v52 = vpop.xlane.xlu1 %2235 }
 0x3b3   : > { %v2329_v33 = vadd.f32 1e-05, %v2313_v41  ;;  %v2296_v61 = vmul.f32 %v4166_v43, %v4166_v43  ;;  %v2264_v50 = vmul.f32 0.03125, %v2236_v52  ;;  %v2408_v27 = vadd.f32 %v4171_v13, %v2387_v54 }
 0x3b4   : > { %v2153_v56 = vpop.xlane.xlu0 %2152  ;;  %v2365_v57 = vmul.f32 %v3299_v49, %v2285_v51  ;;  %v2280_v34 = vsub.f32 %v3974_v53, %v4166_v43 }
 0x3b5   : > { %3306 = vrsqrt.f32 %v2329_v33  ;;  %v2312_v58 = vsub.f32 %v2264_v50, %v2296_v61  ;;  %v4178_v59 = vmul.f32 0.03125, %v2153_v56  ;;  %3188 = vmatpush3.xpose.msk.msra.mxu0 %vm357_vm2, %v2408_v27 }
 0x3b6   : > { %v3301_v60 = vpop.eup %3300  ;;  %v2233_v55 = vpop.xlane.xlu1 %2232  ;;  %v2386_v29 = vmul.f32 %v4164_v37, %v2365_v57  ;;  %3189 = vmatprep.subr.mxu0 %v3420_v1 }
 0x3b7   : > { %v2328_v48 = vadd.f32 1e-05, %v2312_v58  ;;  %v2295_v0 = vmul.f32 %v4178_v59, %v4178_v59  ;;  %v2263_v2 = vmul.f32 0.03125, %v2233_v55  ;;  %v2364_v5 = vmul.f32 %v3301_v60, %v2284_v9 }
 0x3b8   : > { %v2150_v23 = vpop.xlane.xlu0 %2149  ;;  %v2407_v10 = vadd.f32 %v4171_v13, %v2386_v29  ;;  %v2279_v43 = vsub.f32 %v3985_v47, %v4178_v59 }
 0x3b9   : > { %3308 = vrsqrt.f32 %v2328_v48  ;;  %v2311_v14 = vsub.f32 %v2263_v2, %v2295_v0  ;;  %v4188_v6 = vmul.f32 0.03125, %v2150_v23  ;;  %v2385_v46 = vmul.f32 %v4164_v37, %v2364_v5 }
 0x3ba   : > { %v3303_v18 = vpop.eup %3302  ;;  %3190 = vmatpush3.xpose.msk.msra.mxu0 %vm357_vm2, %v2407_v10  ;;  %v2230_v25 = vpop.xlane.xlu1 %2229 }
 0x3bb   : > { %v2327_v17 = vadd.f32 1e-05, %v2311_v14  ;;  %v2294_v22 = vmul.f32 %v4188_v6, %v4188_v6  ;;  %v2262_v3 = vmul.f32 0.03125, %v2230_v25  ;;  %3191 = vmatprep.subr.mxu0 %v3420_v1  ;;  %v2406_v42 = vadd.f32 %v4171_v13, %v2385_v46 }
 0x3bc   : > { %v2147_v26 = vpop.xlane.xlu0 %2146  ;;  %v2363_v28 = vmul.f32 %v3303_v18, %v2283_v63  ;;  %v2278_v59 = vsub.f32 %v3994_v62, %v4188_v6 }
 0x3bd   : > { %3310 = vrsqrt.f32 %v2327_v17  ;;  %v2310_v32 = vsub.f32 %v2262_v3, %v2294_v22  ;;  %v4198_v35 = vmul.f32 0.03125, %v2147_v26 }
 0x3be   : > { %v3305_v30 = vpop.eup %3304  ;;  %3192 = vmatpush3.xpose.msk.msra.mxu0 %vm357_vm2, %v2406_v42  ;;  %v2227_v4 = vpop.xlane.xlu1 %2226  ;;  %v2384_v36 = vmul.f32 %v4164_v37, %v2363_v28 }
 0x3bf   : > { %v2326_v16 = vadd.f32 1e-05, %v2310_v32  ;;  %v2293_v38 = vmul.f32 %v4198_v35, %v4198_v35  ;;  %v2261_v15 = vmul.f32 0.03125, %v2227_v4  ;;  %3193 = vmatprep.subr.mxu0 %v3420_v1  ;;  %v2362_v41 = vmul.f32 %v3305_v30, %v2282_v12 }
 0x3c0   : > { %v2144_v8 = vpop.xlane.xlu0 %2143  ;;  %v2405_v39 = vadd.f32 %v4171_v13, %v2384_v36  ;;  %v2277_v6 = vsub.f32 %v4005_v45, %v4198_v35 }
 0x3c1   : > { %3312 = vrsqrt.f32 %v2326_v16  ;;  %v2309_v49 = vsub.f32 %v2261_v15, %v2293_v38  ;;  %v4208_v51 = vmul.f32 0.03125, %v2144_v8  ;;  %v2383_v54 = vmul.f32 %v4164_v37, %v2362_v41 }
 0x3c2   : > { %v3307_v11 = vpop.eup %3306  ;;  %3194 = vmatpush3.xpose.msk.msra.mxu0 %vm357_vm2, %v2405_v39  ;;  %v2224_v52 = vpop.xlane.xlu1 %2223 }
 0x3c3   : > { %v2325_v33 = vadd.f32 1e-05, %v2309_v49  ;;  %v2292_v61 = vmul.f32 %v4208_v51, %v4208_v51  ;;  %v2260_v50 = vmul.f32 0.03125, %v2224_v52  ;;  %3195 = vmatprep.subr.mxu0 %v3420_v1  ;;  %v2404_v27 = vadd.f32 %v4171_v13, %v2383_v54 }
 0x3c4   : > { %v2141_v56 = vpop.xlane.xlu0 %2140  ;;  %v2361_v57 = vmul.f32 %v3307_v11, %v2281_v21  ;;  %v2276_v45 = vsub.f32 %v4012_v7, %v4208_v51 }
 0x3c5   : > { %3314 = vrsqrt.f32 %v2325_v33  ;;  %v2308_v58 = vsub.f32 %v2260_v50, %v2292_v61  ;;  %v4218_v60 = vmul.f32 0.03125, %v2141_v56 }
 0x3c6   : > { %v3309_v31 = vpop.eup %3308  ;;  %3196 = vmatpush3.xpose.msk.msra.mxu0 %vm357_vm2, %v2404_v27  ;;  %v2221_v9 = vpop.xlane.xlu1 %2220  ;;  %v2382_v55 = vmul.f32 %v4164_v37, %v2361_v57 }
 0x3c7   : > { %v2324_v29 = vadd.f32 1e-05, %v2308_v58  ;;  %v2291_v48 = vmul.f32 %v4218_v60, %v4218_v60  ;;  %v2259_v0 = vmul.f32 0.03125, %v2221_v9  ;;  %3197 = vmatprep.subr.mxu0 %v3420_v1  ;;  %v2360_v10 = vmul.f32 %v3309_v31, %v2280_v34 }
 0x3c8   : > { %v2138_v2 = vpop.xlane.xlu0 %2137  ;;  %v2403_v23 = vadd.f32 %v4171_v13, %v2382_v55 }
 0x3c9   : > { %3316 = vrsqrt.f32 %v2324_v29  ;;  %v2307_v5 = vsub.f32 %v2259_v0, %v2291_v48  ;;  %v4228_v14 = vmul.f32 0.03125, %v2138_v2  ;;  %v2381_v63 = vmul.f32 %v4164_v37, %v2360_v10 }
 0x3ca   : > { %v3311_v53 = vpop.eup %3310  ;;  %3198 = vmatpush3.xpose.msk.msra.mxu0 %vm357_vm2, %v2403_v23  ;;  %v2218_v18 = vpop.xlane.xlu1 %2217  ;;  %v2275_v29 = vsub.f32 %v4022_v20, %v4218_v60 }
 0x3cb   : > { %v2323_v25 = vadd.f32 1e-05, %v2307_v5  ;;  %v2290_v46 = vmul.f32 %v4228_v14, %v4228_v14  ;;  %v2258_v17 = vmul.f32 0.03125, %v2218_v18  ;;  %3199 = vmatprep.subr.mxu0 %v3420_v1  ;;  %v2402_v3 = vadd.f32 %v4171_v13, %v2381_v63 }
 0x3cc   : > { %v2135_v22 = vpop.xlane.xlu0 %2134  ;;  %v2359_v26 = vmul.f32 %v3311_v53, %v2279_v43  ;;  %v2274_v10 = vsub.f32 %v4029_v24, %v4228_v14 }
 0x3cd   : > { %3318 = vrsqrt.f32 %v2323_v25  ;;  %v2306_v42 = vsub.f32 %v2258_v17, %v2290_v46  ;;  %v4238_v28 = vmul.f32 0.03125, %v2135_v22 }
 0x3ce   : > { %v3313_v47 = vpop.eup %3312  ;;  %3200 = vmatpush3.xpose.msk.msra.mxu0 %vm357_vm2, %v2402_v3  ;;  %v2215_v32 = vpop.xlane.xlu1 %2214  ;;  %v2380_v30 = vmul.f32 %v4164_v37, %v2359_v26 }
 0x3cf   : > { %v2322_v12 = vadd.f32 1e-05, %v2306_v42  ;;  %v2289_v4 = vmul.f32 %v4238_v28, %v4238_v28  ;;  %v2257_v36 = vmul.f32 0.03125, %v2215_v32  ;;  %3201 = vmatprep.subr.mxu0 %v3420_v1  ;;  %v2358_v15 = vmul.f32 %v3313_v47, %v2278_v59 }
 0x3d0   : > { %v2132_v16 = vpop.xlane.xlu0 %2131  ;;  %v2401_v38 = vadd.f32 %v4171_v13, %v2380_v30  ;;  %v2273_v43 = vsub.f32 %v4045_v44, %v4238_v28 }
 0x3d1   : > { %3320 = vrsqrt.f32 %v2322_v12  ;;  %v2305_v8 = vsub.f32 %v2257_v36, %v2289_v4  ;;  %v2176_v39 = vmul.f32 0.03125, %v2132_v16  ;;  %v2379_v49 = vmul.f32 %v4164_v37, %v2358_v15 }
 0x3d2   : > { %v3315_v62 = vpop.eup %3314  ;;  %3202 = vmatpush3.xpose.msk.msra.mxu0 %vm357_vm2, %v2401_v38  ;;  %v2212_v41 = vpop.xlane.xlu1 %2211 }
 0x3d3   : > { %v2321_v11 = vadd.f32 1e-05, %v2305_v8  ;;  %v2288_v21 = vmul.f32 %v2176_v39, %v2176_v39  ;;  %v2256_v52 = vmul.f32 0.03125, %v2212_v41  ;;  %3203 = vmatprep.subr.mxu0 %v3420_v1  ;;  %v2400_v33 = vadd.f32 %v4171_v13, %v2379_v49 }
 0x3d4   : > { %v2129_v54 = vpop.xlane.xlu0 %2128  ;;  %v2357_v61 = vmul.f32 %v3315_v62, %v2277_v6  ;;  %v2272_v25 = vsub.f32 %v4056_v40, %v2176_v39 }
 0x3d5   : > { %3322 = vrsqrt.f32 %v2321_v11  ;;  %v2304_v50 = vsub.f32 %v2256_v52, %v2288_v21  ;;  %v2175_v56 = vmul.f32 0.03125, %v2129_v54 }
 0x3d6   : > { %v3317_v27 = vpop.eup %3316  ;;  %3204 = vmatpush3.xpose.msk.msra.mxu0 %vm357_vm2, %v2400_v33  ;;  %v2209_v35 = vpop.xlane.xlu1 %2208  ;;  %v2378_v57 = vmul.f32 %v4164_v37, %v2357_v61 }
 0x3d7   : > { %v2320_v58 = vadd.f32 1e-05, %v2304_v50  ;;  %v2287_v31 = vmul.f32 %v2175_v56, %v2175_v56  ;;  %v2255_v34 = vmul.f32 0.03125, %v2209_v35  ;;  %3205 = vmatprep.subr.mxu0 %v3420_v1  ;;  %v2356_v55 = vmul.f32 %v3317_v27, %v2276_v45 }
 0x3d8   : > { %v2399_v9 = vadd.f32 %v4171_v13, %v2378_v57  ;;  %v2271_v3 = vsub.f32 %v4071_v19, %v2175_v56  ;;  %v2409_v19 = vld [vmem:[%s4349_s3 + $0x6] sm:$0x1]  ;;  %v2537_v57 = vld [vmem:[%s274_s12] sm:$0x1] }
 0x3d9   : > { %3324 = vrsqrt.f32 %v2320_v58  ;;  %v2303_v48 = vsub.f32 %v2255_v34, %v2287_v31  ;;  %v2377_v7 = vmul.f32 %v4164_v37, %v2356_v55  ;;  %v882_v32 = vpop.f32.mrf.mxu0  ;;  %vm2538_vm6 = vcmp.ne.f32.partialorder %v2537_v57, 0.0 }
 0x3da   : > { %v3319_v0 = vpop.eup %3318  ;;  %3206 = vmatpush3.xpose.msk.msra.mxu0 %vm357_vm2, %v2399_v9 }
 0x3db   : > { %v2319_v51 = vadd.f32 1e-05, %v2303_v48  ;;  %3207 = vmatprep.subr.mxu0 %v3420_v1  ;;  %v2355_v2 = vmul.f32 %v3319_v0, %v2275_v29  ;;  %v2398_v23 = vadd.f32 %v4171_v13, %v2377_v7  ;;  %v3051_v30 = vpop.f32.mrf.mxu0 }
 0x3dc   : > { %v2414_v58 = vpop.permute.xlu0 %2413 }
 0x3dd   : > { %3326 = vrsqrt.f32 %v2319_v51  ;;  %v2376_v5 = vmul.f32 %v4164_v37, %v2355_v2 }
 0x3de   : > { %v3321_v20 = vpop.eup %3320  ;;  %3208 = vmatpush3.xpose.msk.msra.mxu0 %vm357_vm2, %v2398_v23  ;;  %v887_v12 = vpop.f32.mrf.mxu0 }
 0x3df   : > { %3209 = vmatprep.subr.mxu0 %v3420_v1  ;;  %v2397_v60 = vadd.f32 %v4171_v13, %v2376_v5  ;;  %v2354_v53 = vmul.f32 %v3321_v20, %v2274_v10 }
 0x3e0   : > { %v3054_v4 = vpop.f32.mrf.mxu0 }
 0x3e1   : > { %v2375_v18 = vmul.f32 %v4164_v37, %v2354_v53 }
 0x3e2   : > { %v3323_v63 = vpop.eup %3322  ;;  %3210 = vmatpush3.xpose.msk.msra.mxu0 %vm357_vm2, %v2397_v60 }
 0x3e3   : > { %3211 = vmatprep.subr.mxu0 %v3420_v1  ;;  %v2396_v24 = vadd.f32 %v4171_v13, %v2375_v18  ;;  %v2353_v14 = vmul.f32 %v3323_v63, %v2273_v43  ;;  %v892_v36 = vpop.f32.mrf.mxu0 }
 0x3e5   : > { %v2374_v46 = vmul.f32 %v4164_v37, %v2353_v14 }
 0x3e6   : > { %v3325_v17 = vpop.eup %3324  ;;  %3212 = vmatpush3.xpose.msk.msra.mxu0 %vm357_vm2, %v2396_v24 }
 0x3e7   : > { %3213 = vmatprep.subr.mxu0 %v3420_v1  ;;  %v2395_v44 = vadd.f32 %v4171_v13, %v2374_v46  ;;  %v2352_v22 = vmul.f32 %v3325_v17, %v2272_v25 }
 0x3e9   : > { %v2373_v26 = vmul.f32 %v4164_v37, %v2352_v22 }
 0x3ea   : > { %v3327_v42 = vpop.eup %3326  ;;  %3214 = vmatpush3.xpose.msk.msra.mxu0 %vm357_vm2, %v2395_v44 }
 0x3eb   : > { %3215 = vmatprep.subr.mxu0 %v3420_v1  ;;  %v2394_v40 = vadd.f32 %v4171_v13, %v2373_v26  ;;  %v2351_v28 = vmul.f32 %v3327_v42, %v2271_v3 }
 0x3ed   : > { %v2372_v47 = vmul.f32 %v4164_v37, %v2351_v28  ;;  %v3057_v37 = vpop.f32.mrf.mxu0 }
 0x3ee   : > { %3216 = vmatpush3.xpose.msk.msra.mxu0 %vm357_vm2, %v2394_v40 }
 0x3ef   : > { %3217 = vmatprep.subr.mxu0 %v3420_v1  ;;  %v2393_v59 = vadd.f32 %v4171_v13, %v2372_v47  ;;  %v897_v16 = vpop.f32.mrf.mxu0 }
 0x3f1   : > { %v3060_v38 = vpop.f32.mrf.mxu0 }
 0x3f2   : > { %3218 = vmatpush3.xpose.msk.msra.mxu0 %vm357_vm2, %v2393_v59 }
 0x3f3   : > { %v902_v15 = vpop.f32.mrf.mxu0 }
 0x3f5   : > { %3220 = vmatmul.mubr.msk.f32.vlgmr.msra.gmra.mxu0 %vm357_vm2, %v2409_v19  ;;  %v3063_v1 = vpop.f32.mrf.mxu0 }
 0x3f7   : > { %v907_v8 = vpop.f32.mrf.mxu0 }
 0x3f9   : > { %v3066_v13 = vpop.f32.mrf.mxu0 }
 0x3fb   : > { %v912_v39 = vpop.f32.mrf.mxu0 }
 0x3fd   : > { %v3069_v62 = vpop.f32.mrf.mxu0 }
 0x3ff   : > { %v917_v6 = vpop.f32.mrf.mxu0 }
 0x401   : > { %v3072_v41 = vpop.f32.mrf.mxu0 }
 0x403   : > { %v922_v49 = vpop.f32.mrf.mxu0 }
 0x405   : > { %v3075_v11 = vpop.f32.mrf.mxu0 }
 0x407   : > { %v927_v21 = vpop.f32.mrf.mxu0 }
 0x409   : > { %v3078_v52 = vpop.f32.mrf.mxu0 }
 0x40b   : > { %v932_v54 = vpop.f32.mrf.mxu0 }
 0x40d   : > { %v3081_v33 = vpop.f32.mrf.mxu0 }
 0x40f   : > { %v937_v61 = vpop.f32.mrf.mxu0 }
 0x411   : > { %v3084_v50 = vpop.f32.mrf.mxu0 }
 0x413   : > { %v942_v56 = vpop.f32.mrf.mxu0 }
 0x415   : > { %v3087_v27 = vpop.f32.mrf.mxu0 }
 0x417   : > { %v947_v45 = vpop.f32.mrf.mxu0 }
 0x419   : > { %v3090_v35 = vpop.f32.mrf.mxu0 }
 0x4b5   : > { %v2533_v31 = vpop.f32.mrf.mxu0 }
 0x4b6   : > { %v2534_v34 = vadd.f32 %v2533_v31, %v2414_v58 }
 0x4b7   : > { %v3221_v9 = vpop.f32.mrf.mxu0 }
 0x4b8   : > { %v2539_v55 = vsel %vm2538_vm6, %v2534_v34, 0.0 }
 0x4b9   : > { %2540 = vst [vmem:[%s259_s14] sm:$0x1] %v2539_v55 }
 0x4ba   : > { %3355 = shalt.err (!%p3352_p5)
}
 0x4bb   : > { %s3356_s29 = scalar_lea.hbm %s4306_s17, 16  ;;  %s3360_s10 = scalar_lea.hbm %s4351_s5, 32 }
 0x4bc   : > { %p3357_p6 = scmp.ne.s32.totalorder %s4306_s17, %s3356_s29  ;;  %p3361_p10 = scmp.lt.s32.totalorder %s4306_s17, %s4351_s5 }
 0x4bd   : > { %p3362_p11 = scmp.lt.s32.totalorder %s3360_s10, %s3356_s29 }
 0x4be   : > { %p3358_p7 = pnand %p3357_p6, %p3494_p4 }
 0x4bf   : > { %p3363_p12 = por %p3362_p11, %p3361_p10 }
 0x4c0   : > { %p3359_p9 = pneg %p3358_p7 }
 0x4c2   : > { %p3364_p13 = pnand %p3363_p12, %p3359_p9 }
 0x4c4   : > { %3367 = shalt.err (!%p3364_p13)
}
 0x4c5   : > { %3231 = dma.vmem_to_hbm [thread:$0]  (%p3494_p4), %s2556_s15, 16, %s4306_s17, %s2542_s24  }
 0x4c6 PF: > { %p3237_p0 = scmp.ge.s32.totalorder %s3418_s23, 2  ;;  %s2567_s14 = sand.u32 1, %s3398_s18  }
 0x4c7   : > { %s2568_s16 = scalar_lea.sflag [#allocation3], %s2567_s14 }
 0x4c8   : > { %p3234_p1 = pnand %p3237_p0, %p3501_p8 }
 0x4ca   : > { %p3235_p2 = pneg %p3234_p1 }
 0x4cc   : > { %3393 = dma.done.wait (%p3235_p2), %s2568_s16, 16  }
 0x4cd   : > { %3395 = vsyncadd (%p3235_p2), %s2568_s16, 4294967280  ;;  %s18_s23 = sadd.s32 1, %s3418_s23   ;;  %s4354_s18 = smov %s3402_s19 }
 0x4ce   : > { %p15_p3 = scmp.ge.s32.totalorder %s18_s23, 4   ;;  %s4355_s19 = smov %s3406_s20 }
 0x4cf   : > { %s4356_s20 = smov %s3507_s6  ;;  %s4357_s21 = smov %s3414_s22 }
 0x4d0   : > { %s4358_s22 = smov %s4360_s26  ;;  %17 = sbr.rel (!%p15_p3) target bundleno = 4 (0x4), region = 82 }
 0x4d5   :  { %2572 = vsyncpa [#allocation3], 1 }
 0x4d6   :  { %2574 = vsyncpa [#allocation3 + $0x1], 1 }

</bundles_post_ra>
